<compile_context>
chip_gen: v7x
topology: tpu7x:2x2x1
jax: 0.10.0
libtpu: 0.0.40
codegen_flags: <defaults>
</compile_context>

<pallas_src>
import functools

import jax
import jax.numpy as jnp
from jax import lax
from jax.experimental import pallas as pl
from jax.experimental.pallas import tpu as pltpu

BN_EPS = 1e-5


# ---------------------------------------------------------------------------
# VMEM sizing / tile selection helpers
# ---------------------------------------------------------------------------
def _ceil_to(v, m):
    return -(-v // m) * m


def _padded_bytes(shape, itemsize):
    """Bytes of `shape` after (sublane, lane) tile padding for this dtype."""
    sub = max(8, 32 // itemsize)          # 8 rows (f32), 16 (bf16), 32 (int8)
    s = list(shape)
    s[-1] = _ceil_to(s[-1], 128)
    if len(s) >= 2:
        s[-2] = _ceil_to(s[-2], sub)
    n = 1
    for d in s:
        n *= d
    return n * itemsize


def _step_vmem_bytes(TH, W, C1, C2, act_itemsize):
    """Per-grid-step VMEM footprint: double-buffered blocks + in-kernel temps."""
    body = _padded_bytes((TH, W, C1), act_itemsize)
    halo = _padded_bytes((1, W, C1), act_itemsize)
    outb = _padded_bytes((TH, W, C2), 4)                 # conservative f32 out
    wgt = _padded_bytes((9 * C1, C2), act_itemsize)
    strip = _padded_bytes((TH + 2, W + 2, C1), act_itemsize)
    col = _padded_bytes((TH * W, 9 * C1), act_itemsize)  # im2col temporary
    acc = _padded_bytes((TH * W, C2), 4)                 # f32 matmul result
    return 2 * (body + 2 * halo + outb) + wgt + strip + 2 * col + acc


def _choose_block_h(H, W, C1, C2, act_itemsize, n_batch):
    """Strip height: as large as a modest VMEM budget allows, preferring an H
    divisor (avoids the masked partial strip), and >= 2 total grid steps so
    both v7x TensorCores get work even for N == 1."""
    budget = 12 << 20
    th = min(H, 128)
    while th > 8 and _step_vmem_bytes(th, W, C1, C2, act_itemsize) > budget:
        th = max(8, th // 2)
    th = max(1, min(th, H))
    for cand in range(th, max(th // 2, 1) - 1, -1):      # prefer a divisor of H
        if H % cand == 0:
            th = cand
            break
    if n_batch * pl.cdiv(H, th) < 2 and H > 1:           # megacore balance
        th = pl.cdiv(H, 2)
    return int(th)


def _vmem_limit_bytes(TH, W, C1, C2, act_itemsize):
    est = _step_vmem_bytes(TH, W, C1, C2, act_itemsize)
    # Clamp to 48 MiB: safe headroom on v7x (64 MiB physical VMEM per core).
    # On 128-MiB parts (v5e/v6e) this could be raised for very large tiles.
    return int(min(max(2 * est, 16 << 20), 48 << 20))


# ---------------------------------------------------------------------------
# Core NHWC entry point: fused equivalent 3x3 conv (pad=1) + bias + SiLU
# ---------------------------------------------------------------------------
def repconvn_forward_nhwc(x_nhwc, params, *, block_h=None, out_dtype=None):
    """x_nhwc: (N, H, W, C1) -> (N, H, W, C2).  Compute dtype == x_nhwc.dtype
    (pass bf16 activations to halve HBM traffic; accumulation is always f32)."""
    N, H, W, C1 = x_nhwc.shape
    cdt = x_nhwc.dtype
    if out_dtype is None:
        out_dtype = cdt
    w_mat = params["w_mat"].astype(cdt)                  # (9*C1, C2)
    assert w_mat.shape[0] == 9 * C1, "weight layout must be (9*C1, C2)"
    C2 = w_mat.shape[1]
    bias = params["bias"].astype(jnp.float32).reshape(1, C2)

    itemsize = jnp.dtype(cdt).itemsize
    if block_h is None:
        TH = _choose_block_h(H, W, C1, C2, itemsize, N)
    else:
        TH = int(min(block_h, H))
    n_hb = pl.cdiv(H, TH)                                # partial last strip OK

    def kernel(xb_ref, xt_ref, xbt_ref, w_ref, b_ref, o_ref, strip_ref):
        # xb_ref   : (1, TH, W, C1)  body rows of the strip
        # xt_ref   : (1, 1,  W, C1)  row just above the strip (clamped/masked)
        # xbt_ref  : (1, 1,  W, C1)  row just below the strip (clamped/masked)
        # w_ref    : (9*C1, C2)      equivalent 3x3 weights, row = tap*C1 + ci
        # b_ref    : (1, C2)         equivalent bias (f32)
        # o_ref    : (1, TH, W, C2)
        # strip_ref: (TH+2, W+2, C1) VMEM scratch: zero-padded strip
        i = pl.program_id(1)

        # ---- assemble the zero-padded strip in VMEM ------------------------
        # Left/right padding columns rewritten every step (no cross-iteration
        # scratch state -> safe under megacore grid sharding).
        zcol = jnp.zeros((TH + 2, 1, C1), strip_ref.dtype)
        strip_ref[:, 0:1, :] = zcol
        strip_ref[:, W + 1:W + 2, :] = zcol

        # Top/bottom halo rows, zeroed at the image borders.
        top = jnp.where(i == 0, jnp.zeros_like(xt_ref[0]), xt_ref[0])
        bot = jnp.where((i + 1) * TH >= H, jnp.zeros_like(xbt_ref[0]),
                        xbt_ref[0])
        strip_ref[0:1, 1:W + 1, :] = top
        strip_ref[TH + 1:TH + 2, 1:W + 1, :] = bot

        body = xb_ref[0]
        if H % TH != 0:  # masked partial last strip (rows past H are garbage)
            rows = lax.broadcasted_iota(jnp.int32, (TH, W, C1), 0)
            body = jnp.where(rows < (H - i * TH), body, jnp.zeros_like(body))
        strip_ref[1:TH + 1, 1:W + 1, :] = body

        # ---- im2col: ONE (TH*W, 9*C1) x (9*C1, C2) MXU matmul --------------
        patches = [
            strip_ref[ky:ky + TH, kx:kx + W, :].reshape(TH * W, C1)
            for ky in range(3) for kx in range(3)
        ]
        col = jnp.concatenate(patches, axis=-1)          # (TH*W, 9*C1)
        z = jnp.dot(col, w_ref[...], preferred_element_type=jnp.float32)
        z = z + b_ref[...]                               # bias (f32)
        z = z * jax.nn.sigmoid(z)                        # SiLU (exp -> EUP)
        o_ref[...] = z.reshape(1, TH, W, C2).astype(o_ref.dtype)

    return pl.pallas_call(
        kernel,
        out_shape=jax.ShapeDtypeStruct((N, H, W, C2), out_dtype),
        grid=(N, n_hb),
        in_specs=[
            # body rows of the strip
            pl.BlockSpec((1, TH, W, C1), lambda n, i: (n, i, 0, 0)),
            # one-row halos above / below (block size 1 along H => element-row
            # addressing; clamped into range, masked to zero at borders)
            pl.BlockSpec((1, 1, W, C1),
                         lambda n, i: (n, jnp.maximum(i * TH - 1, 0), 0, 0)),
            pl.BlockSpec((1, 1, W, C1),
                         lambda n, i: (n, jnp.minimum((i + 1) * TH, H - 1),
                                       0, 0)),
            # weights + bias: constant blocks, stay resident in VMEM
            pl.BlockSpec((9 * C1, C2), lambda n, i: (0, 0)),
            pl.BlockSpec((1, C2), lambda n, i: (0, 0)),
        ],
        out_specs=pl.BlockSpec((1, TH, W, C2), lambda n, i: (n, i, 0, 0)),
        scratch_shapes=[pltpu.VMEM((TH + 2, W + 2, C1), cdt)],
        compiler_params=pltpu.CompilerParams(
            dimension_semantics=("parallel", "parallel"),
            vmem_limit_bytes=_vmem_limit_bytes(TH, W, C1, C2, itemsize)),
    )(x_nhwc, x_nhwc, x_nhwc, w_mat, bias)


# ---------------------------------------------------------------------------
# NCHW convenience wrapper (matches the PyTorch module's layout)
# ---------------------------------------------------------------------------
@functools.partial(jax.jit,
                   static_argnames=("block_h", "compute_dtype", "out_dtype"))
def repconvn_forward_pallas(x_nchw, params, *, block_h=None,
                            compute_dtype=None, out_dtype=None):
    """x_nchw: (N, C1, H, W) -> (N, C2, H, W) in out_dtype (default: compute
    dtype).  Casts BEFORE the layout transpose so both HBM transpose passes run
    at the narrow dtype.  Prefer repconvn_forward_nhwc in NHWC models: that
    removes both transposes entirely."""
    if compute_dtype is None:
        compute_dtype = x_nchw.dtype
    x = jnp.transpose(x_nchw.astype(compute_dtype), (0, 2, 3, 1))    # NHWC
    y = repconvn_forward_nhwc(x, params, block_h=block_h, out_dtype=out_dtype)
    return jnp.transpose(y, (0, 3, 1, 2))                            # NCHW


# ---------------------------------------------------------------------------
# Parameter setup: raw two-branch conv+BN params and the fused equivalents
# ---------------------------------------------------------------------------
def _fold_bn(w_oihw, gamma, beta, mean, var, eps=BN_EPS):
    scale = gamma / jnp.sqrt(var + eps)
    return w_oihw * scale[:, None, None, None], beta - mean * scale


def init_repconvn_params(key, c1, c2):
    ks = jax.random.split(key, 10)
    raw = dict(
        # conv1: 3x3, pad=1, + BN
        w3=0.1 * jax.random.normal(ks[0], (c2, c1, 3, 3), jnp.float32),
        g3=1.0 + 0.1 * jax.random.normal(ks[1], (c2,), jnp.float32),
        b3=0.1 * jax.random.normal(ks[2], (c2,), jnp.float32),
        m3=0.1 * jax.random.normal(ks[3], (c2,), jnp.float32),
        v3=jnp.abs(jax.random.normal(ks[4], (c2,), jnp.float32)) + 0.5,
        # conv2: 1x1, pad=0, + BN
        w1=0.2 * jax.random.normal(ks[5], (c2, c1, 1, 1), jnp.float32),
        g1=1.0 + 0.1 * jax.random.normal(ks[6], (c2,), jnp.float32),
        b1=0.1 * jax.random.normal(ks[7], (c2,), jnp.float32),
        m1=0.1 * jax.random.normal(ks[8], (c2,), jnp.float32),
        v1=jnp.abs(jax.random.normal(ks[9], (c2,), jnp.float32)) + 0.5,
    )
    w3f, bias3 = _fold_bn(raw["w3"], raw["g3"], raw["b3"], raw["m3"], raw["v3"])
    w1f, bias1 = _fold_bn(raw["w1"], raw["g1"], raw["b1"], raw["m1"], raw["v1"])
    # pad folded 1x1 into the 3x3 center tap and sum (get_equivalent_kernel_bias)
    w_eq = w3f.at[:, :, 1, 1].add(w1f[:, :, 0, 0])          # (c2, c1, 3, 3)
    b_eq = bias3 + bias1
    # im2col weight layout: (9*C1, C2), row index = (ky*3 + kx)*C1 + ci
    w_mat = jnp.transpose(w_eq, (2, 3, 1, 0)).reshape(9 * c1, c2)
    return raw, dict(w_mat=w_mat, bias=b_eq)


# ---------------------------------------------------------------------------
# Plain-JAX reference: the literal two-branch forward of RepConvN
# ---------------------------------------------------------------------------
def repconvn_reference(x_nchw, raw):
    def bn(v, g, b, m, var):
        s = g / jnp.sqrt(var + BN_EPS)
        return v * s[None, :, None, None] + (b - m * s)[None, :, None, None]

    y3 = lax.conv_general_dilated(x_nchw, raw["w3"], (1, 1), ((1, 1), (1, 1)),
                                  dimension_numbers=("NCHW", "OIHW", "NCHW"))
    y1 = lax.conv_general_dilated(x_nchw, raw["w1"], (1, 1), "VALID",
                                  dimension_numbers=("NCHW", "OIHW", "NCHW"))
    z = (bn(y3, raw["g3"], raw["b3"], raw["m3"], raw["v3"])
         + bn(y1, raw["g1"], raw["b1"], raw["m1"], raw["v1"]))
    return z * jax.nn.sigmoid(z)


if __name__ == "__main__":
    key = jax.random.PRNGKey(0)
    k_x, k_p = jax.random.split(key)

    N, C1_IN, C2_OUT, H, W = 2, 4, 8, 16, 16
    x = jax.random.normal(k_x, (N, C1_IN, H, W), jnp.float32)
    raw, fused = init_repconvn_params(k_p, C1_IN, C2_OUT)
    ref = repconvn_reference(x, raw)

    # 1) f32, block_h=8 -> grid (2, 2): exercises interior halos + borders.
    out = jax.block_until_ready(repconvn_forward_pallas(x, fused, block_h=8))
    assert out.shape == (N, C2_OUT, H, W)
    assert jnp.allclose(out, ref, atol=1e-4, rtol=1e-4), "f32 mismatch (TH=8)"

    # 2) auto tile height (VMEM-budget-driven, divisor-preferring).
    out2 = jax.block_until_ready(repconvn_forward_pallas(x, fused))
    assert jnp.allclose(out2, ref, atol=1e-4, rtol=1e-4), "f32 mismatch (auto)"

    # 3) non-dividing tile height -> exercises the masked partial last strip.
    out3 = jax.block_until_ready(repconvn_forward_pallas(x, fused, block_h=5))
    assert jnp.allclose(out3, ref, atol=1e-4, rtol=1e-4), "f32 mismatch (TH=5)"

    # 4) bf16 compute + bf16 output path (halved HBM traffic), loose tolerance.
    out_bf = jax.block_until_ready(
        repconvn_forward_pallas(x, fused, compute_dtype=jnp.bfloat16))
    assert out_bf.dtype == jnp.bfloat16
    assert float(jnp.max(jnp.abs(out_bf.astype(jnp.float32) - ref))) < 0.15, \
        "bf16 mismatch"

    print("KERNEL_OK")
</pallas_src>

<mosaic_0001>
module attributes {stable_mosaic.version = 11 : i64} {
  func.func @kernel(%arg0: i32, %arg1: i32, %arg2: memref<1x8x16x4xf32, #tpu.memory_space<vmem>>, %arg3: memref<1x1x16x4xf32, #tpu.memory_space<vmem>>, %arg4: memref<1x1x16x4xf32, #tpu.memory_space<vmem>>, %arg5: memref<36x8xf32, #tpu.memory_space<vmem>>, %arg6: memref<1x8xf32, #tpu.memory_space<vmem>>, %arg7: memref<1x8x16x8xf32, #tpu.memory_space<vmem>>, %arg8: memref<10x18x4xf32, #tpu.memory_space<vmem>>) attributes {dimension_semantics = [#tpu.dimension_semantics<parallel>, #tpu.dimension_semantics<parallel>], iteration_bounds = array<i64: 2, 2>, scalar_prefetch = 0 : i64, scratch_operands = 1 : i64, tpu.core_type = #tpu.core_type<tc>, window_params = [{transform_indices = @transform_0, window_bounds = array<i64: 1, 8, 16, 4>}, {transform_indices = @transform_1, window_bounds = array<i64: 1, 1, 16, 4>}, {transform_indices = @transform_2, window_bounds = array<i64: 1, 1, 16, 4>}, {pipeline_mode = #tpu.pipeline_mode<synchronous>, transform_indices = @transform_3, window_bounds = array<i64: 36, 8>}, {pipeline_mode = #tpu.pipeline_mode<synchronous>, transform_indices = @transform_4, window_bounds = array<i64: 1, 8>}, {transform_indices = @transform_5, window_bounds = array<i64: 1, 8, 16, 8>}]} {
    %cst = arith.constant 0.000000e+00 : f32
    %0 = vector.broadcast %cst : f32 to vector<10x1x4xf32>
    %c0 = arith.constant 0 : index
    %c0_0 = arith.constant 0 : index
    %c0_1 = arith.constant 0 : index
    %1 = vector.load %arg8[%c0, %c0_0, %c0_1] : memref<10x18x4xf32, #tpu.memory_space<vmem>>, vector<10x1x4xf32>
    tpu.vector_store %arg8[%c0, %c0_0, %c0_1], %0 {strides = array<i32>} : memref<10x18x4xf32, #tpu.memory_space<vmem>>, vector<10x1x4xf32>,
    %c0_2 = arith.constant 0 : index
    %c17 = arith.constant 17 : index
    %c0_3 = arith.constant 0 : index
    %2 = vector.load %arg8[%c0_2, %c17, %c0_3] : memref<10x18x4xf32, #tpu.memory_space<vmem>>, vector<10x1x4xf32>
    tpu.vector_store %arg8[%c0_2, %c17, %c0_3], %0 {strides = array<i32>} : memref<10x18x4xf32, #tpu.memory_space<vmem>>, vector<10x1x4xf32>,
    %c0_i32 = arith.constant 0 : i32
    %3 = arith.cmpi eq, %arg1, %c0_i32 : i32
    %cst_4 = arith.constant 0.000000e+00 : f32
    %4 = vector.broadcast %cst_4 : f32 to vector<1x16x4xf32>
    %c0_5 = arith.constant 0 : index
    %c0_6 = arith.constant 0 : index
    %c0_7 = arith.constant 0 : index
    %c0_8 = arith.constant 0 : index
    %5 = vector.load %arg3[%c0_5, %c0_6, %c0_7, %c0_8] : memref<1x1x16x4xf32, #tpu.memory_space<vmem>>, vector<1x1x16x4xf32>
    %6 = vector.shape_cast %5 : vector<1x1x16x4xf32> to vector<1x16x4xf32>
    %7 = arith.select %3, %4, %6 : vector<1x16x4xf32>
    %c1_i32 = arith.constant 1 : i32
    %8 = arith.addi %arg1, %c1_i32 : i32
    %c8_i32 = arith.constant 8 : i32
    %9 = arith.muli %8, %c8_i32 : i32
    %c16_i32 = arith.constant 16 : i32
    %10 = arith.cmpi sge, %9, %c16_i32 : i32
    %cst_9 = arith.constant 0.000000e+00 : f32
    %11 = vector.broadcast %cst_9 : f32 to vector<1x16x4xf32>
    %c0_10 = arith.constant 0 : index
    %c0_11 = arith.constant 0 : index
    %c0_12 = arith.constant 0 : index
    %c0_13 = arith.constant 0 : index
    %12 = vector.load %arg4[%c0_10, %c0_11, %c0_12, %c0_13] : memref<1x1x16x4xf32, #tpu.memory_space<vmem>>, vector<1x1x16x4xf32>
    %13 = vector.shape_cast %12 : vector<1x1x16x4xf32> to vector<1x16x4xf32>
    %14 = arith.select %10, %11, %13 : vector<1x16x4xf32>
    %c0_14 = arith.constant 0 : index
    %c1 = arith.constant 1 : index
    %c0_15 = arith.constant 0 : index
    %15 = vector.load %arg8[%c0_14, %c1, %c0_15] : memref<10x18x4xf32, #tpu.memory_space<vmem>>, vector<1x16x4xf32>
    tpu.vector_store %arg8[%c0_14, %c1, %c0_15], %7 {strides = array<i32>} : memref<10x18x4xf32, #tpu.memory_space<vmem>>, vector<1x16x4xf32>,
    %c9 = arith.constant 9 : index
    %c1_16 = arith.constant 1 : index
    %c0_17 = arith.constant 0 : index
    %16 = vector.load %arg8[%c9, %c1_16, %c0_17] : memref<10x18x4xf32, #tpu.memory_space<vmem>>, vector<1x16x4xf32>
    tpu.vector_store %arg8[%c9, %c1_16, %c0_17], %14 {strides = array<i32>} : memref<10x18x4xf32, #tpu.memory_space<vmem>>, vector<1x16x4xf32>,
    %c0_18 = arith.constant 0 : index
    %c0_19 = arith.constant 0 : index
    %c0_20 = arith.constant 0 : index
    %c0_21 = arith.constant 0 : index
    %17 = vector.load %arg2[%c0_18, %c0_19, %c0_20, %c0_21] : memref<1x8x16x4xf32, #tpu.memory_space<vmem>>, vector<1x8x16x4xf32>
    %18 = vector.shape_cast %17 : vector<1x8x16x4xf32> to vector<8x16x4xf32>
    %c1_22 = arith.constant 1 : index
    %c1_23 = arith.constant 1 : index
    %c0_24 = arith.constant 0 : index
    %19 = vector.load %arg8[%c1_22, %c1_23, %c0_24] : memref<10x18x4xf32, #tpu.memory_space<vmem>>, vector<8x16x4xf32>
    tpu.vector_store %arg8[%c1_22, %c1_23, %c0_24], %18 {strides = array<i32>} : memref<10x18x4xf32, #tpu.memory_space<vmem>>, vector<8x16x4xf32>,
    %c0_25 = arith.constant 0 : index
    %c0_26 = arith.constant 0 : index
    %c0_27 = arith.constant 0 : index
    %20 = vector.load %arg8[%c0_25, %c0_26, %c0_27] : memref<10x18x4xf32, #tpu.memory_space<vmem>>, vector<8x16x4xf32>
    %21 = vector.shape_cast %20 : vector<8x16x4xf32> to vector<128x4xf32>
    %c0_28 = arith.constant 0 : index
    %c1_29 = arith.constant 1 : index
    %c0_30 = arith.constant 0 : index
    %22 = vector.load %arg8[%c0_28, %c1_29, %c0_30] : memref<10x18x4xf32, #tpu.memory_space<vmem>>, vector<8x16x4xf32>
    %23 = vector.shape_cast %22 : vector<8x16x4xf32> to vector<128x4xf32>
    %c0_31 = arith.constant 0 : index
    %c2 = arith.constant 2 : index
    %c0_32 = arith.constant 0 : index
    %24 = vector.load %arg8[%c0_31, %c2, %c0_32] : memref<10x18x4xf32, #tpu.memory_space<vmem>>, vector<8x16x4xf32>
    %25 = vector.shape_cast %24 : vector<8x16x4xf32> to vector<128x4xf32>
    %c1_33 = arith.constant 1 : index
    %c0_34 = arith.constant 0 : index
    %c0_35 = arith.constant 0 : index
    %26 = vector.load %arg8[%c1_33, %c0_34, %c0_35] : memref<10x18x4xf32, #tpu.memory_space<vmem>>, vector<8x16x4xf32>
    %27 = vector.shape_cast %26 : vector<8x16x4xf32> to vector<128x4xf32>
    %c1_36 = arith.constant 1 : index
    %c1_37 = arith.constant 1 : index
    %c0_38 = arith.constant 0 : index
    %28 = vector.load %arg8[%c1_36, %c1_37, %c0_38] : memref<10x18x4xf32, #tpu.memory_space<vmem>>, vector<8x16x4xf32>
    %29 = vector.shape_cast %28 : vector<8x16x4xf32> to vector<128x4xf32>
    %c1_39 = arith.constant 1 : index
    %c2_40 = arith.constant 2 : index
    %c0_41 = arith.constant 0 : index
    %30 = vector.load %arg8[%c1_39, %c2_40, %c0_41] : memref<10x18x4xf32, #tpu.memory_space<vmem>>, vector<8x16x4xf32>
    %31 = vector.shape_cast %30 : vector<8x16x4xf32> to vector<128x4xf32>
    %c2_42 = arith.constant 2 : index
    %c0_43 = arith.constant 0 : index
    %c0_44 = arith.constant 0 : index
    %32 = vector.load %arg8[%c2_42, %c0_43, %c0_44] : memref<10x18x4xf32, #tpu.memory_space<vmem>>, vector<8x16x4xf32>
    %33 = vector.shape_cast %32 : vector<8x16x4xf32> to vector<128x4xf32>
    %c2_45 = arith.constant 2 : index
    %c1_46 = arith.constant 1 : index
    %c0_47 = arith.constant 0 : index
    %34 = vector.load %arg8[%c2_45, %c1_46, %c0_47] : memref<10x18x4xf32, #tpu.memory_space<vmem>>, vector<8x16x4xf32>
    %35 = vector.shape_cast %34 : vector<8x16x4xf32> to vector<128x4xf32>
    %c2_48 = arith.constant 2 : index
    %c2_49 = arith.constant 2 : index
    %c0_50 = arith.constant 0 : index
    %36 = vector.load %arg8[%c2_48, %c2_49, %c0_50] : memref<10x18x4xf32, #tpu.memory_space<vmem>>, vector<8x16x4xf32>
    %37 = vector.shape_cast %36 : vector<8x16x4xf32> to vector<128x4xf32>
    %38 = tpu.concatenate %21, %23, %25, %27, %29, %31, %33, %35, %37 in 1 : vector<128x4xf32>, vector<128x4xf32>, vector<128x4xf32>, vector<128x4xf32>, vector<128x4xf32>, vector<128x4xf32>, vector<128x4xf32>, vector<128x4xf32>, vector<128x4xf32> -> vector<128x36xf32>
    %c0_51 = arith.constant 0 : index
    %c0_52 = arith.constant 0 : index
    %39 = vector.load %arg5[%c0_51, %c0_52] : memref<36x8xf32, #tpu.memory_space<vmem>>, vector<36x8xf32>
    %cst_53 = arith.constant dense<0.000000e+00> : vector<128x8xf32>
    %40 = tpu.matmul %38, %39, %cst_53 {dimension_numbers = #tpu.dot_dimension_numbers<[1], [0], [0], [1], [0, 0, 1, 1], [], []>} : vector<128x36xf32>, vector<36x8xf32>, vector<128x8xf32> -> vector<128x8xf32>
    %c0_54 = arith.constant 0 : index
    %c0_55 = arith.constant 0 : index
    %41 = vector.load %arg6[%c0_54, %c0_55] : memref<1x8xf32, #tpu.memory_space<vmem>>, vector<1x8xf32>
    %42 = vector.broadcast %41 : vector<1x8xf32> to vector<128x8xf32>
    %43 = arith.addf %40, %42 : vector<128x8xf32>
    %44 = arith.negf %43 : vector<128x8xf32>
    %45 = math.exp %44 : vector<128x8xf32>
    %cst_56 = arith.constant 1.000000e+00 : f32
    %46 = vector.broadcast %cst_56 : f32 to vector<128x8xf32>
    %47 = arith.addf %46, %45 : vector<128x8xf32>
    %48 = arith.divf %46, %47 : vector<128x8xf32>
    %49 = arith.mulf %43, %48 : vector<128x8xf32>
    %50 = vector.shape_cast %49 : vector<128x8xf32> to vector<1x8x16x8xf32>
    %c0_57 = arith.constant 0 : index
    %c0_58 = arith.constant 0 : index
    %c0_59 = arith.constant 0 : index
    %c0_60 = arith.constant 0 : index
    %51 = vector.load %arg7[%c0_57, %c0_58, %c0_59, %c0_60] : memref<1x8x16x8xf32, #tpu.memory_space<vmem>>, vector<1x8x16x8xf32>
    tpu.vector_store %arg7[%c0_57, %c0_58, %c0_59, %c0_60], %50 {strides = array<i32>} : memref<1x8x16x8xf32, #tpu.memory_space<vmem>>, vector<1x8x16x8xf32>,
    return
  }
  func.func @transform_0(%arg0: i32, %arg1: i32) -> (i32, i32, i32, i32) {
    %c0_i32 = arith.constant 0 : i32
    %c0_i32_0 = arith.constant 0 : i32
    %c0_i32_1 = arith.constant 0 : i32
    return %arg0, %arg1, %c0_i32, %c0_i32_0 : i32, i32, i32, i32
  }
  func.func @transform_1(%arg0: i32, %arg1: i32) -> (i32, i32, i32, i32) {
    %c8_i32 = arith.constant 8 : i32
    %0 = arith.muli %arg1, %c8_i32 : i32
    %c1_i32 = arith.constant 1 : i32
    %1 = arith.subi %0, %c1_i32 : i32
    %c0_i32 = arith.constant 0 : i32
    %2 = arith.maxsi %1, %c0_i32 : i32
    %c0_i32_0 = arith.constant 0 : i32
    %c0_i32_1 = arith.constant 0 : i32
    %c0_i32_2 = arith.constant 0 : i32
    return %arg0, %2, %c0_i32_0, %c0_i32_1 : i32, i32, i32, i32
  }
  func.func @transform_2(%arg0: i32, %arg1: i32) -> (i32, i32, i32, i32) {
    %c1_i32 = arith.constant 1 : i32
    %0 = arith.addi %arg1, %c1_i32 : i32
    %c8_i32 = arith.constant 8 : i32
    %1 = arith.muli %0, %c8_i32 : i32
    %c15_i32 = arith.constant 15 : i32
    %2 = arith.minsi %1, %c15_i32 : i32
    %c0_i32 = arith.constant 0 : i32
    %c0_i32_0 = arith.constant 0 : i32
    %c0_i32_1 = arith.constant 0 : i32
    return %arg0, %2, %c0_i32, %c0_i32_0 : i32, i32, i32, i32
  }
  func.func @transform_3(%arg0: i32, %arg1: i32) -> (i32, i32) {
    %c0_i32 = arith.constant 0 : i32
    %c0_i32_0 = arith.constant 0 : i32
    %c0_i32_1 = arith.constant 0 : i32
    return %c0_i32, %c0_i32_0 : i32, i32
  }
  func.func @transform_4(%arg0: i32, %arg1: i32) -> (i32, i32) {
    %c0_i32 = arith.constant 0 : i32
    %c0_i32_0 = arith.constant 0 : i32
    %c0_i32_1 = arith.constant 0 : i32
    return %c0_i32, %c0_i32_0 : i32, i32
  }
  func.func @transform_5(%arg0: i32, %arg1: i32) -> (i32, i32, i32, i32) {
    %c0_i32 = arith.constant 0 : i32
    %c0_i32_0 = arith.constant 0 : i32
    %c0_i32_1 = arith.constant 0 : i32
    return %arg0, %arg1, %c0_i32, %c0_i32_0 : i32, i32, i32, i32
  }
}

</mosaic_0001>

<bundles_post_ra>
// kernel: repconvn_forward_pallas.1
= control target key start
LH: loop header
LB: loop body
LE: loop exit
PB: predicated region body
PF: predicated region fallthrough
CT: control target
= control target key end

     0   :  { %s2098_s18 = smov 0   ;;  %s2100_s19 = smov 0   ;;  %s2812_s0 = inlined_call_operand.vmem [shape: f32[2,16,16,4], index: 0, kind: input, shape index: {}, may-alias: {0,1,2}]   ;;  %s2813_s1 = inlined_call_operand.vmem [shape: f32[2,16,16,4], index: 1, kind: input, shape index: {}, may-alias: {0,1,2}]   ;;  %s2814_s2 = inlined_call_operand.vmem [shape: f32[2,16,16,4], index: 2, kind: input, shape index: {}, may-alias: {0,1,2}]   ;;  %s2815_s3 = inlined_call_operand.vmem [shape: f32[36,8], index: 3, kind: input, shape index: {}]   ;;  %s2816_s4 = inlined_call_operand.vmem [shape: f32[1,8], index: 4, kind: input, shape index: {}]   ;;  %s2817_s5 = inlined_call_operand.vmem [shape: f32[2,16,16,8], index: 5, kind: output, shape index: {}]  }
   0x1   :  { %s2102_s20 = smov 0   ;;  %s2104_s21 = smov 0  }
   0x2   :  { %s2106_s22 = smov 0  }
   0x3 LB: > { %s24_s23 = sadd.s32 1, %s2049_s20  ;;  %s27_s24 = sadd.s32 1, %s2053_s21  ;;  %s2057_s22 = sphi %s2106_s22, %s15_s22   ;;  %s2053_s21 = sphi %s2104_s21, %s2839_s21   ;;  %s2049_s20 = sphi %s2102_s20, %s2838_s20   ;;  %s2045_s19 = sphi %s2100_s19, %s2837_s19   ;;  %s2041_s18 = sphi %s2098_s18, %s2836_s18  }
   0x4   : > { %p25_p0 = scmp.ge.s32.totalorder %s24_s23, 2  ;;  %p1752_p1 = scmp.ge.s32.totalorder %s2057_s22, 1 }
   0x5   : > { %p273_p2 = scmp.lt.s32.totalorder %s2057_s22, 5 }
   0x6   : > { %s2841_s23 = smov (%p25_p0, %s24_s23), 0  ;;  %s2843_s24 = smov (!%p25_p0, %s27_s24), %s2053_s21 }
   0x7   : > { %p274_p3 = pnand %p1752_p1, %p273_p2  ;;  %p29_p4 = scmp.ge.s32.totalorder %s2843_s24, 2 }
   0x9   : > { %s2845_s24 = smov (%p29_p4, %s2843_s24), 0  ;;  %277 = sbr.rel (%p274_p3) target bundleno = 650 (0x28a), region = 40 }
  0x10   : > { %s2133_s25 = sshll.u32 %s2041_s18, 3  ;;  %p338_p5 = scmp.lt.s32.totalorder %s2045_s19, 1  ;;  %vm393_vm0 = vcmask 24576   ;;  %v2059_v0 = vmov 0.0   ;;  %vm432_vm1 = vcmask 31744   ;;  %v1263_v45 = vld [vmem:[%s2815_s3] sm:$0xff] }
  0x11   : > { %p340_p6 = scmp.lt.s32.totalorder %s2133_s25, 15  ;;  %395 = vst.msk [vmem:[#allocation2 + $0x18] sm:$0x1] %vm393_vm0, %v2059_v0  ;;  %394 = vst.msk [vmem:[#allocation2] sm:$0x1] %vm393_vm0, %v2059_v0  ;;  %s1758_s30 = sadd.s32 4294967295, %s2133_s25 }
  0x12   : > { %396 = vst.msk [vmem:[#allocation2 + $0x30] sm:$0x1] %vm393_vm0, %v2059_v0  ;;  %397 = vst.msk [vmem:[#allocation2 + $0x48] sm:$0x1] %vm393_vm0, %v2059_v0  ;;  %s2847_s19 = smov (!%p338_p5, %s2045_s19), 1  ;;  %p350_p7 = scmp.gt.s32.totalorder %s1758_s30, 0 }
  0x13   : > { %398 = vst.msk [vmem:[#allocation2 + $0x60] sm:$0x1] %vm393_vm0, %v2059_v0  ;;  %399 = vst.msk [vmem:[#allocation2 + $0x78] sm:$0x1] %vm393_vm0, %v2059_v0  ;;  %s341_s26 = scalar_select %p340_p6, %s2133_s25, 15  ;;  %v1264_v46 = vld [vmem:[%s2815_s3 + $0x8] sm:$0xff] }
  0x14   : > { %400 = vst.msk [vmem:[#allocation2 + $0x90] sm:$0x1] %vm393_vm0, %v2059_v0  ;;  %401 = vst.msk [vmem:[#allocation2 + $0xa8] sm:$0x1] %vm393_vm0, %v2059_v0  ;;  %s2163_s27 = sshll.u32 %s2847_s19, 5  ;;  %p1759_p8 = scmp.lt.s32.totalorder %s1758_s30, 15  ;;  %v1880_v49 = vpack.c.bf16 %v1264_v46, %v1263_v45 }
  0x15   : > { %402 = vst.msk [vmem:[#allocation2 + $0xc0] sm:$0x1] %vm393_vm0, %v2059_v0  ;;  %403 = vst.msk [vmem:[#allocation2 + $0xd8] sm:$0x1] %vm393_vm0, %v2059_v0  ;;  %s1754_s28 = sshll.u32 %s341_s26, 1  ;;  %p414_p9 = scmp.eq.s32.totalorder %s2041_s18, 0 }
  0x16   : > { %404 = vst.msk [vmem:[#allocation2 + $0x11] sm:$0x1] %vm393_vm0, %v2059_v0  ;;  %405 = vst.msk [vmem:[#allocation2 + $0x29] sm:$0x1] %vm393_vm0, %v2059_v0  ;;  %s2166_s29 = sadd.s32 %s2163_s27, %s1754_s28  ;;  %s2060_s19 = smov 4   ;;  %1881 = vmatprep.subr.bf16.mxu0 %v1880_v49  ;;  %1888 = vmatprep.subr.bf16.mxu1 %v1880_v49  ;;  %v1265_v50 = vld [vmem:[%s2815_s3 + $0x10] sm:$0xff] }
  0x17   : > { %406 = vst.msk [vmem:[#allocation2 + $0x41] sm:$0x1] %vm393_vm0, %v2059_v0  ;;  %407 = vst.msk [vmem:[#allocation2 + $0x59] sm:$0x1] %vm393_vm0, %v2059_v0  ;;  %s1756_s6 = sshll.u32 %s2166_s29, 3  ;;  %s2061_s26 = smov 8   ;;  %1883 = vmatpush3.bf16.msra.mxu0 %v1880_v49  ;;  %1891 = vmatpush3.bf16.msra.mxu1 %v1880_v49 }
  0x18   : > { %408 = vst.msk [vmem:[#allocation2 + $0x71] sm:$0x1] %vm393_vm0, %v2059_v0  ;;  %409 = vst.msk [vmem:[#allocation2 + $0x89] sm:$0x1] %vm393_vm0, %v2059_v0  ;;  %s2175_s9 = scalar_lea.vmem %s2812_s0, %s1756_s6  ;;  %s2062_s18 = smov 12   ;;  %v1266_v51 = vld [vmem:[%s2815_s3 + $0x18] sm:$0xff] }
  0x19   : > { %410 = vst.msk [vmem:[#allocation2 + $0xa1] sm:$0x1] %vm393_vm0, %v2059_v0  ;;  %411 = vst.msk [vmem:[#allocation2 + $0xb9] sm:$0x1] %vm393_vm0, %v2059_v0  ;;  %v445_v1 = vld [vmem:[%s2175_s9 + $0x38] sm:$0xff]  ;;  %v444_v2 = vld [vmem:[%s2175_s9 + $0x30] sm:$0xff]  ;;  %v1884_v54 = vpack.c.bf16 %v1266_v51, %v1265_v50 }
  0x1a   : > { %412 = vst.msk [vmem:[#allocation2 + $0xd1] sm:$0x1] %vm393_vm0, %v2059_v0  ;;  %413 = vst.msk [vmem:[#allocation2 + $0xe9] sm:$0x1] %vm393_vm0, %v2059_v0  ;;  %v438_v3 = vld [vmem:[%s2175_s9] sm:$0xff]  ;;  %s351_s10 = scalar_select %p350_p7, %s1758_s30, 0 }
  0x1b   : > { %462 = vst.msk [vmem:[#allocation2 + $0x69] sm:$0xff] %vm432_vm1, %v445_v1  ;;  %461 = vst.msk [vmem:[#allocation2 + $0x61] sm:$0xff] %vm432_vm1, %v444_v2  ;;  %v439_v4 = vld [vmem:[%s2175_s9 + $0x8] sm:$0xff]  ;;  %v446_v5 = vld [vmem:[%s2175_s9 + $0x40] sm:$0xff]  ;;  %s1944_s17 = scalar_select %p414_p9, 0, 255  ;;  %1885 = vmatprep.subr.bf16.mxu0 %v1884_v54  ;;  %1889 = vmatprep.subr.bf16.mxu1 %v1884_v54 }
  0x1c   : > { %455 = vst.msk [vmem:[#allocation2 + $0x19] sm:$0xff] %vm432_vm1, %v438_v3  ;;  %v447_v6 = vld [vmem:[%s2175_s9 + $0x48] sm:$0xff]  ;;  %456 = vst.msk [vmem:[#allocation2 + $0x21] sm:$0xff] %vm432_vm1, %v439_v4  ;;  %s2849_s10 = smov (!%p1759_p8, %s351_s10), 15  ;;  %v448_v7 = vld [vmem:[%s2175_s9 + $0x50] sm:$0xff]  ;;  %s2063_s28 = smov 16   ;;  %1887 = vmatpush3.bf16.msra.mxu0 %v1884_v54  ;;  %1892 = vmatpush3.bf16.msra.mxu1 %v1884_v54 }
  0x1d   : > { %463 = vst.msk [vmem:[#allocation2 + $0x79] sm:$0xff] %vm432_vm1, %v446_v5  ;;  %464 = vst.msk [vmem:[#allocation2 + $0x81] sm:$0xff] %vm432_vm1, %v447_v6  ;;  %v440_v8 = vld [vmem:[%s2175_s9 + $0x10] sm:$0xff]  ;;  %v449_v9 = vld [vmem:[%s2175_s9 + $0x58] sm:$0xff]  ;;  %s1764_s11 = sshll.u32 %s2849_s10, 1  ;;  %s2064_s30 = smov 20  }
  0x1e   : > { %465 = vst.msk [vmem:[#allocation2 + $0x91] sm:$0xff] %vm432_vm1, %v448_v7  ;;  %457 = vst.msk [vmem:[#allocation2 + $0x31] sm:$0xff] %vm432_vm1, %v440_v8  ;;  %v441_v10 = vld [vmem:[%s2175_s9 + $0x18] sm:$0xff]  ;;  %v450_v11 = vld [vmem:[%s2175_s9 + $0x60] sm:$0xff]  ;;  %s358_s12 = sadd.s32 %s1764_s11, %s2163_s27  ;;  %s2065_s7 = smov 24   ;;  %vm1324_vm2 = vcmask 1043456  }
  0x1f   : > { %466 = vst.msk [vmem:[#allocation2 + $0x99] sm:$0xff] %vm432_vm1, %v449_v9  ;;  %v442_v12 = vld [vmem:[%s2175_s9 + $0x20] sm:$0xff]  ;;  %458 = vst.msk [vmem:[#allocation2 + $0x39] sm:$0xff] %vm432_vm1, %v441_v10  ;;  %v451_v13 = vld [vmem:[%s2175_s9 + $0x68] sm:$0xff]  ;;  %s1766_s13 = sshll.u32 %s358_s12, 3  ;;  %s2066_s8 = smov 28  }
  0x20   : > { %467 = vst.msk [vmem:[#allocation2 + $0xa9] sm:$0xff] %vm432_vm1, %v450_v11  ;;  %459 = vst.msk [vmem:[#allocation2 + $0x49] sm:$0xff] %vm432_vm1, %v442_v12  ;;  %v443_v14 = vld [vmem:[%s2175_s9 + $0x28] sm:$0xff]  ;;  %s360_s16 = scalar_lea.vmem %s2813_s1, %s1766_s13  ;;  %v452_v35 = vld [vmem:[%s2175_s9 + $0x70] sm:$0xff]  ;;  %s1822_s11 = sadd.s32 8, %s2133_s25  ;;  %vm1144_vm3 = vcmask 64512  }
  0x21   : > { %468 = vst.msk [vmem:[#allocation2 + $0xb1] sm:$0xff] %vm432_vm1, %v451_v13  ;;  %460 = vst.msk [vmem:[#allocation2 + $0x51] sm:$0xff] %vm432_vm1, %v443_v14  ;;  %v1945_v19 = vld [vmem:[%s360_s16] sm:%s1944_s17]  ;;  %v1948_v20 = vld [vmem:[%s360_s16 + $0x8] sm:%s1944_s17]  ;;  %s2067_s17 = smov 32   ;;  %p367_p10 = scmp.lt.s32.totalorder %s1822_s11, 15 }
  0x22   : > { %v2211_v15 = vld [vmem:[#allocation2 + $0x69] sm:$0xff]  ;;  %v2213_v16 = vld [vmem:[#allocation2 + $0x61] sm:$0xff]  ;;  %433 = vst.msk [vmem:[#allocation2 + $0x1] sm:$0xff] %vm432_vm1, %v1945_v19  ;;  %434 = vst.msk [vmem:[#allocation2 + $0x9] sm:$0xff] %vm432_vm1, %v1948_v20  ;;  %p424_p11 = scmp.ge.s32.totalorder %s1822_s11, 16  ;;  %vm1161_vm4 = vcmask 97280  }
  0x23   : > { %650 = vrot.lane.b32.xlu1 %v2211_v15, %s2060_s19  ;;  %648 = vrot.lane.b32.xlu0 %v2213_v16, %s2060_s19  ;;  %v2221_v17 = vld [vmem:[#allocation2 + $0x62] sm:$0xff]  ;;  %v2223_v18 = vld [vmem:[#allocation2 + $0x18] sm:$0xff]  ;;  %v2231_v21 = vld [vmem:[#allocation2 + $0x6a] sm:$0xff]  ;;  %469 = vst.msk [vmem:[#allocation2 + $0xc1] sm:$0xff] %vm432_vm1, %v452_v35  ;;  %s368_s12 = scalar_select %p367_p10, %s1822_s11, 15  ;;  %vm1178_vm5 = vcmask 130048  }
  0x24   : > { %v2233_v22 = vld [vmem:[#allocation2 + $0x20] sm:$0xff]  ;;  %v2239_v23 = vld [vmem:[#allocation2 + $0x78] sm:$0xff]  ;;  %s1950_s10 = scalar_select %p424_p11, 0, 255  ;;  %vm1195_vm6 = vcmask 162816   ;;  %vm1212_vm7 = vcmask 195584  }
  0x25   : > { %v2244_v25 = vld [vmem:[#allocation2 + $0x80] sm:$0xff]  ;;  %v2282_v38 = vld [vmem:[#allocation2 + $0x90] sm:$0xff]  ;;  %v453_v40 = vld [vmem:[%s2175_s9 + $0x78] sm:$0xff]  ;;  %s2851_s12 = smov (!%p367_p10, %s368_s12), 15  ;;  %vm1229_vm8 = vcmask 228352   ;;  %vm1246_vm9 = vcmask 261120  }
  0x26   : > { %v2251_v29 = vld [vmem:[#allocation2 + $0x79] sm:$0xff]  ;;  %v2259_v31 = vld [vmem:[#allocation2 + $0x81] sm:$0xff]  ;;  %v2284_v39 = vld [vmem:[#allocation2 + $0x30] sm:$0xff]  ;;  %470 = vst.msk [vmem:[#allocation2 + $0xc9] sm:$0xff] %vm432_vm1, %v453_v40  ;;  %s1771_s13 = sshll.u32 %s2851_s12, 1  ;;  %vm1275_vm10 = vcmask 293888  }
  0x27   : > { %712 = vrot.lane.b32.xlu1 %v2221_v17, %s2061_s26  ;;  %760 = vrot.lane.b32.xlu0 %v2223_v18, %s2062_s18  ;;  %v535_v30 = vld [vmem:[#allocation2 + $0x19] sm:$0xff]  ;;  %v536_v32 = vld [vmem:[#allocation2 + $0x21] sm:$0xff]  ;;  %v592_v43 = vld [vmem:[#allocation2 + $0x91] sm:$0xff]  ;;  %s375_s14 = sadd.s32 %s1771_s13, %s2163_s27 }
  0x28   : > { %v2264_v33 = vld [vmem:[#allocation2 + $0x7a] sm:$0xff]  ;;  %v2277_v36 = vld [vmem:[#allocation2 + $0x82] sm:$0xff]  ;;  %v584_v44 = vld [vmem:[#allocation2 + $0x31] sm:$0xff]  ;;  %s1773_s15 = sshll.u32 %s375_s14, 3 }
  0x29   : > { %v487_v24 = vld [vmem:[#allocation2 + $0x1] sm:$0xff]  ;;  %v488_v27 = vld [vmem:[#allocation2 + $0x9] sm:$0xff]  ;;  %2824 = vst [vmem:[#allocation3_spill] sm:$0xff] %v2264_v33  ;;  %2825 = vst [vmem:[#allocation4_spill] sm:$0xff] %v2277_v36  ;;  %s377_s9 = scalar_lea.vmem %s2814_s2, %s1773_s15 }
  0x2a   : > { %v503_v26 = vld [vmem:[#allocation2 + $0x2] sm:$0xff]  ;;  %v504_v28 = vld [vmem:[#allocation2 + $0xa] sm:$0xff]  ;;  %v551_v34 = vld [vmem:[#allocation2 + $0x1a] sm:$0xff] }
  0x2b   : > { %714 = vrot.lane.b32.xlu1 %v2231_v21, %s2061_s26  ;;  %762 = vrot.lane.b32.xlu0 %v2233_v22, %s2062_s18  ;;  %v552_v37 = vld [vmem:[#allocation2 + $0x22] sm:$0xff]  ;;  %v2299_v41 = vld [vmem:[#allocation2 + $0x98] sm:$0xff]  ;;  %v2381_v4 = vld [vmem:[#allocation2 + $0xb0] sm:$0xff] }
  0x2c   : > { %v2301_v42 = vld [vmem:[#allocation2 + $0x38] sm:$0xff]  ;;  %v1267_v55 = vld [vmem:[%s2815_s3 + $0x20] sm:$0xf]  ;;  %v1954_v59 = vld [vmem:[%s377_s9 + $0x8] sm:%s1950_s10]  ;;  %2828 = vst [vmem:[#allocation7_spill] sm:$0xff] %v2381_v4 }
  0x2d   : > { %v593_v47 = vld [vmem:[#allocation2 + $0x99] sm:$0xff]  ;;  %1854 = vmatprep.subr.msk.mxu0 %vm1324_vm2, %v1267_v55  ;;  %1890 = vmatprep.subr.msk.mxu1 %vm1324_vm2, %v1267_v55  ;;  %437 = vst.msk [vmem:[#allocation2 + $0xe1] sm:$0xff] %vm432_vm1, %v1954_v59  ;;  %v2355_v60 = vld [vmem:[#allocation2 + $0xa8] sm:$0xff]  ;;  %v2383_v5 = vld [vmem:[#allocation2 + $0x50] sm:$0xff] }
  0x2e   : > { %v585_v48 = vld [vmem:[#allocation2 + $0x39] sm:$0xff]  ;;  %1855 = vmatpush3.msk.msra.mxu0 %vm1324_vm2, %v1267_v55  ;;  %1893 = vmatpush3.msk.msra.mxu1 %vm1324_vm2, %v1267_v55  ;;  %2826 = vst [vmem:[#allocation5_spill] sm:$0xff] %v2355_v60  ;;  %v2357_v61 = vld [vmem:[#allocation2 + $0x48] sm:$0xff]  ;;  %2829 = vst [vmem:[#allocation8_spill] sm:$0xff] %v2383_v5 }
  0x2f   : > { %776 = vrot.lane.b32.xlu1 %v2239_v23, %s2062_s18  ;;  %632 = vrot.lane.b32.xlu0 %v487_v24, %s2060_s19  ;;  %v608_v52 = vld [vmem:[#allocation2 + $0x92] sm:$0xff]  ;;  %v609_v56 = vld [vmem:[#allocation2 + $0x9a] sm:$0xff]  ;;  %2827 = vst [vmem:[#allocation6_spill] sm:$0xff] %v2357_v61  ;;  %v594_v8 = vld [vmem:[#allocation2 + $0xa9] sm:$0xff] }
  0x30   : > { %v600_v53 = vld [vmem:[#allocation2 + $0x32] sm:$0xff]  ;;  %v601_v57 = vld [vmem:[#allocation2 + $0x3a] sm:$0xff]  ;;  %v586_v9 = vld [vmem:[#allocation2 + $0x49] sm:$0xff] }
  0x31   : > { %v1951_v58 = vld [vmem:[%s377_s9] sm:%s1950_s10]  ;;  %v595_v20 = vld [vmem:[#allocation2 + $0xb1] sm:$0xff] }
  0x32   : > { %436 = vst.msk [vmem:[#allocation2 + $0xd9] sm:$0xff] %vm432_vm1, %v1951_v58  ;;  %v587_v24 = vld [vmem:[#allocation2 + $0x51] sm:$0xff]  ;;  %v479_v59 = vld [vmem:[#allocation2 + $0x60] sm:$0xff] }
  0x33   : > { %778 = vrot.lane.b32.xlu1 %v2244_v25, %s2062_s18  ;;  %696 = vrot.lane.b32.xlu0 %v503_v26, %s2061_s26  ;;  %v611_v46 = vld [vmem:[#allocation2 + $0xb2] sm:$0xff] }
  0x37   : > { %634 = vrot.lane.b32.xlu1 %v488_v27, %s2060_s19  ;;  %698 = vrot.lane.b32.xlu0 %v504_v28, %s2061_s26  ;;  %v610_v28 = vld [vmem:[#allocation2 + $0xaa] sm:$0xff] }
  0x3b   : > { %840 = vrot.lane.b32.xlu1 %v2251_v29, %s2063_s28  ;;  %824 = vrot.lane.b32.xlu0 %v535_v30, %s2063_s28 }
  0x3f   : > { %652 = vrot.lane.b32.xlu1 %v2251_v29, %s2060_s19  ;;  %636 = vrot.lane.b32.xlu0 %v535_v30, %s2060_s19  ;;  %v602_v30 = vld [vmem:[#allocation2 + $0x4a] sm:$0xff] }
  0x43   : > { %842 = vrot.lane.b32.xlu1 %v2259_v31, %s2063_s28  ;;  %826 = vrot.lane.b32.xlu0 %v536_v32, %s2063_s28 }
  0x47   : > { %904 = vrot.lane.b32.xlu1 %v2264_v33, %s2064_s30  ;;  %888 = vrot.lane.b32.xlu0 %v551_v34, %s2064_s30 }
  0x4b   : > { %654 = vrot.lane.b32.xlu1 %v2259_v31, %s2060_s19  ;;  %638 = vrot.lane.b32.xlu0 %v536_v32, %s2060_s19 }
  0x4f   : > { %716 = vrot.lane.b32.xlu1 %v2264_v33, %s2061_s26  ;;  %700 = vrot.lane.b32.xlu0 %v551_v34, %s2061_s26 }
  0x53   : > { %906 = vrot.lane.b32.xlu1 %v2277_v36, %s2064_s30  ;;  %890 = vrot.lane.b32.xlu0 %v552_v37, %s2064_s30 }
  0x57   : > { %968 = vrot.lane.b32.xlu1 %v2282_v38, %s2065_s7  ;;  %952 = vrot.lane.b32.xlu0 %v2284_v39, %s2065_s7 }
  0x5b   : > { %718 = vrot.lane.b32.xlu1 %v2277_v36, %s2061_s26  ;;  %702 = vrot.lane.b32.xlu0 %v552_v37, %s2061_s26 }
  0x5f   : > { %780 = vrot.lane.b32.xlu1 %v2282_v38, %s2062_s18  ;;  %764 = vrot.lane.b32.xlu0 %v2284_v39, %s2062_s18 }
  0x63   : > { %970 = vrot.lane.b32.xlu1 %v2299_v41, %s2065_s7  ;;  %954 = vrot.lane.b32.xlu0 %v2301_v42, %s2065_s7 }
  0x67   : > { %1032 = vrot.lane.b32.xlu1 %v592_v43, %s2066_s8  ;;  %1016 = vrot.lane.b32.xlu0 %v584_v44, %s2066_s8 }
  0x6b   : > { %782 = vrot.lane.b32.xlu1 %v2299_v41, %s2062_s18  ;;  %766 = vrot.lane.b32.xlu0 %v2301_v42, %s2062_s18 }
  0x6f   : > { %844 = vrot.lane.b32.xlu1 %v592_v43, %s2063_s28  ;;  %828 = vrot.lane.b32.xlu0 %v584_v44, %s2063_s28 }
  0x73   : > { %1034 = vrot.lane.b32.xlu1 %v593_v47, %s2066_s8  ;;  %1018 = vrot.lane.b32.xlu0 %v585_v48, %s2066_s8 }
  0x77   : > { %1096 = vrot.lane.b32.xlu1 %v608_v52, %s2067_s17  ;;  %1080 = vrot.lane.b32.xlu0 %v600_v53, %s2067_s17 }
  0x7b   : > { %656 = vrot.lane.b32.xlu1 %v592_v43, %s2060_s19  ;;  %640 = vrot.lane.b32.xlu0 %v584_v44, %s2060_s19 }
  0x7f   : > { %846 = vrot.lane.b32.xlu1 %v593_v47, %s2063_s28  ;;  %830 = vrot.lane.b32.xlu0 %v585_v48, %s2063_s28 }
  0x83   : > { %908 = vrot.lane.b32.xlu1 %v608_v52, %s2064_s30  ;;  %892 = vrot.lane.b32.xlu0 %v600_v53, %s2064_s30 }
  0x87   : > { %1098 = vrot.lane.b32.xlu1 %v609_v56, %s2067_s17  ;;  %1082 = vrot.lane.b32.xlu0 %v601_v57, %s2067_s17 }
  0x8b   : > { %658 = vrot.lane.b32.xlu1 %v593_v47, %s2060_s19  ;;  %642 = vrot.lane.b32.xlu0 %v585_v48, %s2060_s19  ;;  %v603_v47 = vld [vmem:[#allocation2 + $0x52] sm:$0xff] }
  0x8f   : > { %720 = vrot.lane.b32.xlu1 %v608_v52, %s2061_s26  ;;  %704 = vrot.lane.b32.xlu0 %v600_v53, %s2061_s26 }
  0x93   : > { %910 = vrot.lane.b32.xlu1 %v609_v56, %s2064_s30  ;;  %894 = vrot.lane.b32.xlu0 %v601_v57, %s2064_s30 }
  0x95   : > { %v2359_v62 = vpop.permute.xlu1 %650  ;;  %v2361_v63 = vpop.permute.xlu0 %648 }
  0x97   : > { %972 = vrot.lane.b32.xlu1 %v2355_v60, %s2065_s7  ;;  %956 = vrot.lane.b32.xlu0 %v2357_v61, %s2065_s7 }
  0x99   : > { %v2367_v0 = vpop.permute.xlu1 %712  ;;  %v2369_v1 = vpop.permute.xlu0 %760 }
  0x9b   : > { %722 = vrot.lane.b32.xlu1 %v609_v56, %s2061_s26  ;;  %706 = vrot.lane.b32.xlu0 %v601_v57, %s2061_s26  ;;  %v580_v56 = vld [vmem:[#allocation2 + $0xc0] sm:$0xff] }
  0x9d   : > { %v2373_v2 = vpop.permute.xlu1 %714  ;;  %v2375_v3 = vpop.permute.xlu0 %762 }
  0x9f   : > { %784 = vrot.lane.b32.xlu1 %v2355_v60, %s2062_s18  ;;  %768 = vrot.lane.b32.xlu0 %v2357_v61, %s2062_s18 }
  0xa1   : > { %v2385_v6 = vpop.permute.xlu1 %776  ;;  %v2387_v7 = vpop.permute.xlu0 %632 }
  0xa3   : > { %974 = vrot.lane.b32.xlu1 %v2381_v4, %s2065_s7  ;;  %958 = vrot.lane.b32.xlu0 %v2383_v5, %s2065_s7 }
  0xa5   : > { %v2393_v10 = vpop.permute.xlu1 %778  ;;  %v2395_v11 = vpop.permute.xlu0 %696 }
  0xa7   : > { %1036 = vrot.lane.b32.xlu1 %v594_v8, %s2066_s8  ;;  %1020 = vrot.lane.b32.xlu0 %v586_v9, %s2066_s8 }
  0xa9   : > { %v2399_v12 = vpop.permute.xlu1 %634  ;;  %v2401_v13 = vpop.permute.xlu0 %698 }
  0xab   : > { %786 = vrot.lane.b32.xlu1 %v2381_v4, %s2062_s18  ;;  %770 = vrot.lane.b32.xlu0 %v2383_v5, %s2062_s18  ;;  %v581_v4 = vld [vmem:[#allocation2 + $0xc8] sm:$0xff] }
  0xad   : > { %v2407_v14 = vpop.permute.xlu1 %840  ;;  %v2409_v19 = vpop.permute.xlu0 %824 }
  0xaf   : > { %848 = vrot.lane.b32.xlu1 %v594_v8, %s2063_s28  ;;  %832 = vrot.lane.b32.xlu0 %v586_v9, %s2063_s28 }
  0xb1   : > { %v653_v26 = vpop.permute.xlu1 %652  ;;  %v637_v27 = vpop.permute.xlu0 %636 }
  0xb2   : > { %v1130_v5 = vsel %vm432_vm1, %v2223_v18, %v637_v27  ;;  %v480_v27 = vld [vmem:[#allocation2 + $0x68] sm:$0xff] }
  0xb3   : > { %1038 = vrot.lane.b32.xlu1 %v595_v20, %s2066_s8  ;;  %1022 = vrot.lane.b32.xlu0 %v587_v24, %s2066_s8 }
  0xb5   : > { %v2415_v32 = vpop.permute.xlu1 %842  ;;  %v2417_v34 = vpop.permute.xlu0 %826 }
  0xb7   : > { %1100 = vrot.lane.b32.xlu1 %v610_v28, %s2067_s17  ;;  %1084 = vrot.lane.b32.xlu0 %v602_v30, %s2067_s17 }
  0xb9   : > { %v2421_v35 = vpop.permute.xlu1 %904  ;;  %v2423_v37 = vpop.permute.xlu0 %888 }
  0xbb   : > { %660 = vrot.lane.b32.xlu1 %v594_v8, %s2060_s19  ;;  %644 = vrot.lane.b32.xlu0 %v586_v9, %s2060_s19 }
  0xbd   : > { %v2427_v40 = vpop.permute.xlu1 %654  ;;  %v2429_v43 = vpop.permute.xlu0 %638 }
  0xbf   : > { %850 = vrot.lane.b32.xlu1 %v595_v20, %s2063_s28  ;;  %834 = vrot.lane.b32.xlu0 %v587_v24, %s2063_s28 }
  0xc1   : > { %v717_v44 = vpop.permute.xlu1 %716  ;;  %v701_v45 = vpop.permute.xlu0 %700 }
  0xc3   : > { %912 = vrot.lane.b32.xlu1 %v610_v28, %s2064_s30  ;;  %896 = vrot.lane.b32.xlu0 %v602_v30, %s2064_s30 }
  0xc5   : > { %v2435_v48 = vpop.permute.xlu1 %906  ;;  %v2437_v49 = vpop.permute.xlu0 %890 }
  0xc7   : > { %1102 = vrot.lane.b32.xlu1 %v611_v46, %s2067_s17  ;;  %1086 = vrot.lane.b32.xlu0 %v603_v47, %s2067_s17 }
  0xc9   : > { %v2441_v50 = vpop.permute.xlu1 %968  ;;  %v2443_v51 = vpop.permute.xlu0 %952 }
  0xcb   : > { %662 = vrot.lane.b32.xlu1 %v595_v20, %s2060_s19  ;;  %646 = vrot.lane.b32.xlu0 %v587_v24, %s2060_s19 }
  0xcd   : > { %v2447_v52 = vpop.permute.xlu1 %718  ;;  %v2449_v53 = vpop.permute.xlu0 %702 }
  0xcf   : > { %724 = vrot.lane.b32.xlu1 %v610_v28, %s2061_s26  ;;  %708 = vrot.lane.b32.xlu0 %v602_v30, %s2061_s26  ;;  %v471_v28 = vld [vmem:[#allocation2] sm:$0xff]  ;;  %v1138_v30 = vsel %vm432_vm1, %v2239_v23, %v653_v26 }
  0xd0   : > { %v1128_v61 = vsel %vm432_vm1, %v471_v28, %v2387_v7  ;;  %v1136_v7 = vsel %vm432_vm1, %v479_v59, %v2361_v63 }
  0xd1   : > { %v781_v54 = vpop.permute.xlu1 %780  ;;  %v765_v55 = vpop.permute.xlu0 %764 }
  0xd3   : > { %914 = vrot.lane.b32.xlu1 %v611_v46, %s2064_s30  ;;  %898 = vrot.lane.b32.xlu0 %v603_v47, %s2064_s30 }
  0xd5   : > { %v2455_v57 = vpop.permute.xlu1 %970  ;;  %v2457_v58 = vpop.permute.xlu0 %954 }
  0xd7   : > { %976 = vrot.lane.b32.xlu1 %v580_v56, %s2065_s7  ;;  %960 = vrot.lane.b32.xlu0 %v479_v59, %s2065_s7 }
  0xd9   : > { %v1033_v8 = vpop.permute.xlu1 %1032  ;;  %v1017_v9 = vpop.permute.xlu0 %1016 }
  0xdb   : > { %726 = vrot.lane.b32.xlu1 %v611_v46, %s2061_s26  ;;  %710 = vrot.lane.b32.xlu0 %v603_v47, %s2061_s26  ;;  %v1155_v46 = vsel %vm1144_vm3, %v1138_v30, %v717_v44  ;;  %v1147_v47 = vsel %vm1144_vm3, %v1130_v5, %v701_v45  ;;  %v1153_v44 = vsel %vm1144_vm3, %v1136_v7, %v2367_v0  ;;  %v596_v45 = vld [vmem:[#allocation2 + $0xc1] sm:$0xff] }
  0xdc   : > { %v1172_v60 = vsel %vm1161_vm4, %v1155_v46, %v781_v54  ;;  %v1164_v26 = vsel %vm1161_vm4, %v1147_v47, %v765_v55  ;;  %v472_v30 = vld [vmem:[#allocation2 + $0x8] sm:$0xff] }
  0xdd   : > { %v2463_v20 = vpop.permute.xlu1 %782  ;;  %v2465_v24 = vpop.permute.xlu0 %766 }
  0xdf   : > { %788 = vrot.lane.b32.xlu1 %v580_v56, %s2062_s18  ;;  %772 = vrot.lane.b32.xlu0 %v479_v59, %s2062_s18  ;;  %v1145_v56 = vsel %vm1144_vm3, %v1128_v61, %v2395_v11  ;;  %v1170_v61 = vsel %vm1161_vm4, %v1153_v44, %v2385_v6 }
  0xe0   : > { %v1187_v63 = vsel %vm1178_vm5, %v1170_v61, %v2407_v14 }
  0xe1   : > { %v845_v36 = vpop.permute.xlu1 %844  ;;  %v829_v18 = vpop.permute.xlu0 %828  ;;  %v1204_v0 = vsel %vm1195_vm6, %v1187_v63, %v2421_v35 }
  0xe2   : > { %v2482_v33 = vsel %vm1178_vm5, %v1172_v60, %v845_v36  ;;  %v2485_v5 = vsel %vm1178_vm5, %v1164_v26, %v829_v18  ;;  %v1162_v36 = vsel %vm1161_vm4, %v1145_v56, %v2369_v1  ;;  %v1221_v1 = vsel %vm1212_vm7, %v1204_v0, %v2441_v50 }
  0xe3   : > { %978 = vrot.lane.b32.xlu1 %v581_v4, %s2065_s7  ;;  %962 = vrot.lane.b32.xlu0 %v480_v27, %s2065_s7  ;;  %v1179_v54 = vsel %vm1178_vm5, %v1162_v36, %v2409_v19  ;;  %v1238_v14 = vsel %vm1229_vm8, %v1221_v1, %v1033_v8  ;;  %v1129_v8 = vsel %vm432_vm1, %v472_v30, %v2399_v12  ;;  %v597_v12 = vld [vmem:[#allocation2 + $0xc9] sm:$0xff]  ;;  %v598_v30 = vld [vmem:[#allocation2 + $0xd9] sm:$0xff] }
  0xe4   : > { %v1196_v55 = vsel %vm1195_vm6, %v1179_v54, %v2423_v37 }
  0xe5   : > { %v1035_v60 = vpop.permute.xlu1 %1034  ;;  %v1019_v11 = vpop.permute.xlu0 %1018  ;;  %v1213_v6 = vsel %vm1212_vm7, %v1196_v55, %v2443_v51 }
  0xe6   : > { %v1230_v19 = vsel %vm1229_vm8, %v1213_v6, %v1017_v9  ;;  %v1139_v9 = vsel %vm432_vm1, %v2244_v25, %v2427_v40 }
  0xe7   : > { %1040 = vrot.lane.b32.xlu1 %v596_v45, %s2066_s8  ;;  %1024 = vrot.lane.b32.xlu0 %v2213_v16, %s2066_s8  ;;  %v1156_v46 = vsel %vm1144_vm3, %v1139_v9, %v2447_v52 }
  0xe8   : > { %v1173_v26 = vsel %vm1161_vm4, %v1156_v46, %v2463_v20 }
  0xe9   : > { %v1097_v35 = vpop.permute.xlu1 %1096  ;;  %v1081_v59 = vpop.permute.xlu0 %1080 }
  0xea   : > { %v1255_v37 = vsel %vm1246_vm9, %v1238_v14, %v1097_v35  ;;  %v1247_v28 = vsel %vm1246_vm9, %v1230_v19, %v1081_v59  ;;  %v583_v14 = vld [vmem:[#allocation2 + $0xe0] sm:$0xff] }
  0xeb   : > { %790 = vrot.lane.b32.xlu1 %v581_v4, %s2062_s18  ;;  %1868 = vmatprep.mubr.msk.f32.mxu1 %vm1275_vm10, %v1255_v37  ;;  %v1131_v4 = vsel %vm432_vm1, %v2233_v22, %v2429_v43  ;;  %v1146_v43 = vsel %vm1144_vm3, %v1129_v8, %v2401_v13 }
  0xec   : > { %774 = vrot.lane.b32.xlu0 %v480_v27, %s2062_s18  ;;  %1856 = vmatprep.mubr.msk.f32.mxu0 %vm1275_vm10, %v1247_v28  ;;  %v1148_v47 = vsel %vm1144_vm3, %v1131_v4, %v2449_v53  ;;  %v1163_v56 = vsel %vm1161_vm4, %v1146_v43, %v2375_v3 }
  0xed   : > { %v657_v50 = vpop.permute.xlu1 %656  ;;  %v641_v51 = vpop.permute.xlu0 %640  ;;  %v1165_v40 = vsel %vm1161_vm4, %v1148_v47, %v2465_v24  ;;  %v612_v24 = vld [vmem:[#allocation2 + $0xc2] sm:$0xff]  ;;  %v2830_v47 = vld [vmem:[#allocation3_spill] sm:$0xff] }
  0xee   : > { %v1132_v63 = vsel %vm432_vm1, %v2284_v39, %v641_v51 }
  0xef   : > { %852 = vrot.lane.b32.xlu1 %v596_v45, %s2063_s28 }
  0xf0   : > { %836 = vrot.lane.b32.xlu0 %v2213_v16, %s2063_s28  ;;  %v1137_v16 = vsel %vm432_vm1, %v480_v27, %v2359_v62 }
  0xf1   : > { %v847_v18 = vpop.permute.xlu1 %846  ;;  %v831_v22 = vpop.permute.xlu0 %830  ;;  %v1154_v20 = vsel %vm1144_vm3, %v1137_v16, %v2373_v2  ;;  %v1180_v2 = vsel %vm1178_vm5, %v1163_v56, %v2417_v34 }
  0xf2   : > { %v2542_v52 = vsel %vm1178_vm5, %v1173_v26, %v847_v18  ;;  %v2545_v53 = vsel %vm1178_vm5, %v1165_v40, %v831_v22  ;;  %v1171_v13 = vsel %vm1161_vm4, %v1154_v20, %v2393_v10  ;;  %v1197_v45 = vsel %vm1195_vm6, %v1180_v2, %v2437_v49  ;;  %v2831_v22 = vld [vmem:[#allocation4_spill] sm:$0xff] }
  0xf3   : > { %1042 = vrot.lane.b32.xlu1 %v597_v12, %s2066_s8  ;;  %v1188_v62 = vsel %vm1178_vm5, %v1171_v13, %v2415_v32  ;;  %v1214_v10 = vsel %vm1212_vm7, %v1197_v45, %v2457_v58 }
  0xf4   : > { %1026 = vrot.lane.b32.xlu0 %v2211_v15, %s2066_s8  ;;  %v1205_v27 = vsel %vm1195_vm6, %v1188_v62, %v2435_v48  ;;  %v1231_v34 = vsel %vm1229_vm8, %v1214_v10, %v1019_v11  ;;  %v1140_v11 = vsel %vm432_vm1, %v2282_v38, %v657_v50  ;;  %v582_v38 = vld [vmem:[#allocation2 + $0xd8] sm:$0xff] }
  0xf5   : > { %v2558_v7 = vpop.permute.xlu1 %908  ;;  %v2560_v44 = vpop.permute.xlu0 %892  ;;  %v1222_v3 = vsel %vm1212_vm7, %v1205_v27, %v2455_v57 }
  0xf6   : > { %v1239_v32 = vsel %vm1229_vm8, %v1222_v3, %v1035_v60  ;;  %v613_v60 = vld [vmem:[#allocation2 + $0xca] sm:$0xff]  ;;  %v1206_v56 = vsel %vm1195_vm6, %v2482_v33, %v2558_v7  ;;  %v1198_v62 = vsel %vm1195_vm6, %v2485_v5, %v2560_v44 }
  0xf7   : > { %1104 = vrot.lane.b32.xlu1 %v612_v24, %s2067_s17 }
  0xf8   : > { %1088 = vrot.lane.b32.xlu0 %v2221_v17, %s2067_s17 }
  0xf9   : > { %v1099_v61 = vpop.permute.xlu1 %1098  ;;  %v1083_v48 = vpop.permute.xlu0 %1082 }
  0xfa   : > { %v1256_v36 = vsel %vm1246_vm9, %v1239_v32, %v1099_v61  ;;  %v1248_v49 = vsel %vm1246_vm9, %v1231_v34, %v1083_v48 }
  0xfb   : > { %854 = vrot.lane.b32.xlu1 %v597_v12, %s2063_s28  ;;  %1869 = vmatmul.mubr.msk.f32.vlgmr.msra.gmra.mrb[0].mxu1 %vm1275_vm10, %v1256_v36  ;;  %v615_v12 = vld [vmem:[#allocation2 + $0xe2] sm:$0xff] }
  0xfc   : > { %838 = vrot.lane.b32.xlu0 %v2211_v15, %s2063_s28  ;;  %1857 = vmatmul.mubr.msk.f32.vlgmr.msra.gmra.mrb[0].mxu0 %vm1275_vm10, %v1248_v49  ;;  %s2751_s28 = scalar_lea.vmem %s2817_s5, %s1756_s6 }
  0xfd   : > { %v659_v57 = vpop.permute.xlu1 %658  ;;  %v643_v58 = vpop.permute.xlu0 %642 }
  0xfe   : > { %v1141_v19 = vsel %vm432_vm1, %v2299_v41, %v659_v57  ;;  %v1133_v35 = vsel %vm432_vm1, %v2301_v42, %v643_v58  ;;  %v599_v42 = vld [vmem:[#allocation2 + $0xe1] sm:$0xff] }
  0xff   : > { %916 = vrot.lane.b32.xlu1 %v612_v24, %s2064_s30 }
 0x100   : > { %900 = vrot.lane.b32.xlu0 %v2221_v17, %s2064_s30 }
 0x101   : > { %v721_v54 = vpop.permute.xlu1 %720  ;;  %v705_v0 = vpop.permute.xlu0 %704 }
 0x102   : > { %v1157_v15 = vsel %vm1144_vm3, %v1140_v11, %v721_v54  ;;  %v1149_v55 = vsel %vm1144_vm3, %v1132_v63, %v705_v0 }
 0x103   : > { %1106 = vrot.lane.b32.xlu1 %v613_v60, %s2067_s17 }
 0x104   : > { %1090 = vrot.lane.b32.xlu0 %v2231_v21, %s2067_s17 }
 0x105   : > { %v2598_v1 = vpop.permute.xlu1 %910  ;;  %v2600_v17 = vpop.permute.xlu0 %894 }
 0x106   : > { %v1207_v58 = vsel %vm1195_vm6, %v2542_v52, %v2598_v1  ;;  %v2832_v1 = vld [vmem:[#allocation5_spill] sm:$0xff] }
 0x107   : > { %918 = vrot.lane.b32.xlu1 %v613_v60, %s2064_s30  ;;  %v1199_v60 = vsel %vm1195_vm6, %v2545_v53, %v2600_v17 }
 0x108   : > { %902 = vrot.lane.b32.xlu0 %v2231_v21, %s2064_s30 }
 0x109   : > { %v973_v39 = vpop.permute.xlu1 %972  ;;  %v957_v6 = vpop.permute.xlu0 %956 }
 0x10a   : > { %v1223_v2 = vsel %vm1212_vm7, %v1206_v56, %v973_v39  ;;  %v1215_v27 = vsel %vm1212_vm7, %v1198_v62, %v957_v6  ;;  %v2833_v6 = vld [vmem:[#allocation6_spill] sm:$0xff] }
 0x10b   : > { %980 = vrot.lane.b32.xlu1 %v582_v38, %s2065_s7 }
 0x10c   : > { %964 = vrot.lane.b32.xlu0 %v2239_v23, %s2065_s7 }
 0x10d   : > { %v723_v59 = vpop.permute.xlu1 %722  ;;  %v707_v37 = vpop.permute.xlu0 %706 }
 0x10e   : > { %v1158_v28 = vsel %vm1144_vm3, %v1141_v19, %v723_v59  ;;  %v1150_v21 = vsel %vm1144_vm3, %v1133_v35, %v707_v37 }
 0x10f   : > { %982 = vrot.lane.b32.xlu1 %v583_v14, %s2065_s7 }
 0x110   : > { %966 = vrot.lane.b32.xlu0 %v2244_v25, %s2065_s7  ;;  %v614_v25 = vld [vmem:[#allocation2 + $0xda] sm:$0xff] }
 0x111   : > { %v785_v23 = vpop.permute.xlu1 %784  ;;  %v769_v50 = vpop.permute.xlu0 %768 }
 0x112   : > { %v1174_v51 = vsel %vm1161_vm4, %v1157_v15, %v785_v23  ;;  %v1166_v41 = vsel %vm1161_vm4, %v1149_v55, %v769_v50 }
 0x113   : > { %1044 = vrot.lane.b32.xlu1 %v598_v30, %s2066_s8 }
 0x114   : > { %1028 = vrot.lane.b32.xlu0 %v2251_v29, %s2066_s8 }
 0x115   : > { %v975_v8 = vpop.permute.xlu1 %974  ;;  %v959_v9 = vpop.permute.xlu0 %958 }
 0x116   : > { %v1224_v11 = vsel %vm1212_vm7, %v1207_v58, %v975_v8  ;;  %v1216_v63 = vsel %vm1212_vm7, %v1199_v60, %v959_v9 }
 0x117   : > { %1046 = vrot.lane.b32.xlu1 %v599_v42, %s2066_s8 }
 0x118   : > { %1030 = vrot.lane.b32.xlu0 %v2259_v31, %s2066_s8 }
 0x119   : > { %v1037_v4 = vpop.permute.xlu1 %1036  ;;  %v1021_v46 = vpop.permute.xlu0 %1020 }
 0x11a   : > { %v1240_v45 = vsel %vm1229_vm8, %v1223_v2, %v1037_v4  ;;  %v1232_v3 = vsel %vm1229_vm8, %v1215_v27, %v1021_v46 }
 0x11b   : > { %1108 = vrot.lane.b32.xlu1 %v614_v25, %s2067_s17 }
 0x11c   : > { %1092 = vrot.lane.b32.xlu0 %v2830_v47, %s2067_s17 }
 0x11d   : > { %v787_v26 = vpop.permute.xlu1 %786  ;;  %v771_v40 = vpop.permute.xlu0 %770 }
 0x11e   : > { %v1175_v29 = vsel %vm1161_vm4, %v1158_v28, %v787_v26  ;;  %v1167_v18 = vsel %vm1161_vm4, %v1150_v21, %v771_v40 }
 0x11f   : > { %1110 = vrot.lane.b32.xlu1 %v615_v12, %s2067_s17 }
 0x120   : > { %1094 = vrot.lane.b32.xlu0 %v2831_v22, %s2067_s17 }
 0x121   : > { %v849_v31 = vpop.permute.xlu1 %848  ;;  %v833_v43 = vpop.permute.xlu0 %832 }
 0x122   : > { %v2634_v16 = vsel %vm1178_vm5, %v1174_v51, %v849_v31  ;;  %v2637_v20 = vsel %vm1178_vm5, %v1166_v41, %v833_v43 }
 0x125   : > { %v1039_v24 = vpop.permute.xlu1 %1038  ;;  %v1023_v13 = vpop.permute.xlu0 %1022 }
 0x126   : > { %v1241_v54 = vsel %vm1229_vm8, %v1224_v11, %v1039_v24  ;;  %v1233_v0 = vsel %vm1229_vm8, %v1216_v63, %v1023_v13 }
 0x129   : > { %v1101_v10 = vpop.permute.xlu1 %1100  ;;  %v1085_v32 = vpop.permute.xlu0 %1084 }
 0x12a   : > { %v1257_v34 = vsel %vm1246_vm9, %v1240_v45, %v1101_v10  ;;  %v1249_v61 = vsel %vm1246_vm9, %v1232_v3, %v1085_v32 }
 0x12b   : > { %1859 = vmatprep.mubr.msk.f32.mxu0 %vm1275_vm10, %v1249_v61  ;;  %1871 = vmatprep.mubr.msk.f32.mxu1 %vm1275_vm10, %v1257_v34 }
 0x12d   : > { %v661_v33 = vpop.permute.xlu1 %660  ;;  %v645_v5 = vpop.permute.xlu0 %644 }
 0x12e   : > { %v1142_v17 = vsel %vm432_vm1, %v2832_v1, %v661_v33  ;;  %v1134_v14 = vsel %vm432_vm1, %v2833_v6, %v645_v5 }
 0x131   : > { %v851_v7 = vpop.permute.xlu1 %850  ;;  %v835_v44 = vpop.permute.xlu0 %834 }
 0x132   : > { %v1192_v48 = vsel %vm1178_vm5, %v1175_v29, %v851_v7  ;;  %v1184_v36 = vsel %vm1178_vm5, %v1167_v18, %v835_v44 }
 0x135   : > { %v913_v49 = vpop.permute.xlu1 %912  ;;  %v897_v57 = vpop.permute.xlu0 %896 }
 0x136   : > { %v1208_v18 = vsel %vm1195_vm6, %v2634_v16, %v913_v49  ;;  %v1200_v22 = vsel %vm1195_vm6, %v2637_v20, %v897_v57 }
 0x139   : > { %v1103_v15 = vpop.permute.xlu1 %1102  ;;  %v1087_v55 = vpop.permute.xlu0 %1086 }
 0x13a   : > { %v1258_v38 = vsel %vm1246_vm9, %v1241_v54, %v1103_v15  ;;  %v1250_v39 = vsel %vm1246_vm9, %v1233_v0, %v1087_v55 }
 0x13b   : > { %1860 = vmatmul.mubr.msk.f32.gmra.mrb[2].mxu0 %vm1275_vm10, %v1250_v39  ;;  %1872 = vmatmul.mubr.msk.f32.gmra.mrb[2].mxu1 %vm1275_vm10, %v1258_v38 }
 0x13d   : > { %v2669_v52 = vpop.permute.xlu1 %662  ;;  %v2671_v53 = vpop.permute.xlu0 %646 }
 0x141   : > { %v725_v19 = vpop.permute.xlu1 %724  ;;  %v709_v35 = vpop.permute.xlu0 %708 }
 0x142   : > { %v1159_v59 = vsel %vm1144_vm3, %v1142_v17, %v725_v19  ;;  %v1151_v37 = vsel %vm1144_vm3, %v1134_v14, %v709_v35  ;;  %v2834_v17 = vld [vmem:[#allocation7_spill] sm:$0xff]  ;;  %v2835_v35 = vld [vmem:[#allocation8_spill] sm:$0xff] }
 0x143   : > { %v1143_v6 = vsel %vm432_vm1, %v2834_v17, %v2669_v52 }
 0x145   : > { %v915_v28 = vpop.permute.xlu1 %914  ;;  %v899_v21 = vpop.permute.xlu0 %898 }
 0x146   : > { %v1209_v10 = vsel %vm1195_vm6, %v1192_v48, %v915_v28  ;;  %v1201_v32 = vsel %vm1195_vm6, %v1184_v36, %v899_v21  ;;  %v1135_v28 = vsel %vm432_vm1, %v2835_v35, %v2671_v53 }
 0x149   : > { %v977_v30 = vpop.permute.xlu1 %976  ;;  %v961_v23 = vpop.permute.xlu0 %960 }
 0x14a   : > { %v1225_v31 = vsel %vm1212_vm7, %v1208_v18, %v977_v30  ;;  %v1217_v43 = vsel %vm1212_vm7, %v1200_v22, %v961_v23 }
 0x14d   : > { %v727_v50 = vpop.permute.xlu1 %726  ;;  %v711_v51 = vpop.permute.xlu0 %710 }
 0x14e   : > { %v1152_v30 = vsel %vm1144_vm3, %v1135_v28, %v711_v51 }
 0x151   : > { %v789_v41 = vpop.permute.xlu1 %788  ;;  %v773_v42 = vpop.permute.xlu0 %772 }
 0x152   : > { %v1176_v15 = vsel %vm1161_vm4, %v1159_v59, %v789_v41  ;;  %v1168_v38 = vsel %vm1161_vm4, %v1151_v37, %v773_v42  ;;  %v1160_v59 = vsel %vm1144_vm3, %v1143_v6, %v727_v50 }
 0x155   : > { %v979_v8 = vpop.permute.xlu1 %978  ;;  %v963_v9 = vpop.permute.xlu0 %962 }
 0x156   : > { %v1226_v34 = vsel %vm1212_vm7, %v1209_v10, %v979_v8  ;;  %v1218_v61 = vsel %vm1212_vm7, %v1201_v32, %v963_v9 }
 0x159   : > { %v1041_v25 = vpop.permute.xlu1 %1040  ;;  %v1025_v4 = vpop.permute.xlu0 %1024 }
 0x15a   : > { %v1242_v24 = vsel %vm1229_vm8, %v1225_v31, %v1041_v25  ;;  %v1234_v56 = vsel %vm1229_vm8, %v1217_v43, %v1025_v4 }
 0x15d   : > { %v791_v46 = vpop.permute.xlu1 %790 }
 0x15e   : > { %v775_v47 = vpop.permute.xlu0 %774  ;;  %v1177_v23 = vsel %vm1161_vm4, %v1160_v59, %v791_v46 }
 0x15f   : > { %v1169_v8 = vsel %vm1161_vm4, %v1152_v30, %v775_v47 }
 0x161   : > { %v853_v12 = vpop.permute.xlu1 %852 }
 0x162   : > { %v837_v26 = vpop.permute.xlu0 %836  ;;  %v1193_v39 = vsel %vm1178_vm5, %v1176_v15, %v853_v12 }
 0x163   : > { %v1185_v14 = vsel %vm1178_vm5, %v1168_v38, %v837_v26 }
 0x165   : > { %v1043_v40 = vpop.permute.xlu1 %1042 }
 0x166   : > { %v1027_v29 = vpop.permute.xlu0 %1026  ;;  %v1243_v33 = vsel %vm1229_vm8, %v1226_v34, %v1043_v40 }
 0x167   : > { %v1235_v7 = vsel %vm1229_vm8, %v1218_v61, %v1027_v29 }
 0x169   : > { %v1105_v13 = vpop.permute.xlu1 %1104 }
 0x16a   : > { %v1259_v62 = vsel %vm1246_vm9, %v1242_v24, %v1105_v13  ;;  %v1089_v2 = vpop.permute.xlu0 %1088  ;;  %v2740_v24 = vld [vmem:[%s2816_s4] ss:$0 sm:$0xff] }
 0x16b   : > { %v1251_v27 = vsel %vm1246_vm9, %v1234_v56, %v1089_v2  ;;  %1874 = vmatprep.mubr.msk.f32.mxu1 %vm1275_vm10, %v1259_v62 }
 0x16c   : > { %1862 = vmatprep.mubr.msk.f32.mxu0 %vm1275_vm10, %v1251_v27 }
 0x16d   : > { %v855_v16 = vpop.permute.xlu1 %854 }
 0x16e   : > { %v839_v20 = vpop.permute.xlu0 %838  ;;  %v1194_v9 = vsel %vm1178_vm5, %v1177_v23, %v855_v16 }
 0x16f   : > { %v1186_v4 = vsel %vm1178_vm5, %v1169_v8, %v839_v20 }
 0x171   : > { %v917_v45 = vpop.permute.xlu1 %916 }
 0x172   : > { %v901_v3 = vpop.permute.xlu0 %900  ;;  %v1210_v19 = vsel %vm1195_vm6, %v1193_v39, %v917_v45 }
 0x173   : > { %v1202_v21 = vsel %vm1195_vm6, %v1185_v14, %v901_v3 }
 0x175   : > { %v1107_v5 = vpop.permute.xlu1 %1106 }
 0x176   : > { %v1260_v44 = vsel %vm1246_vm9, %v1243_v33, %v1107_v5  ;;  %v1091_v49 = vpop.permute.xlu0 %1090 }
 0x177   : > { %v1252_v57 = vsel %vm1246_vm9, %v1235_v7, %v1091_v49  ;;  %1875 = vmatmul.mubr.msk.f32.gmra.mrb[4].mxu1 %vm1275_vm10, %v1260_v44 }
 0x178   : > { %1863 = vmatmul.mubr.msk.f32.gmra.mrb[4].mxu0 %vm1275_vm10, %v1252_v57 }
 0x179   : > { %v919_v48 = vpop.permute.xlu1 %918 }
 0x17a   : > { %v903_v36 = vpop.permute.xlu0 %902  ;;  %v1211_v51 = vsel %vm1195_vm6, %v1194_v9, %v919_v48 }
 0x17b   : > { %v1203_v12 = vsel %vm1195_vm6, %v1186_v4, %v903_v36 }
 0x17d   : > { %v981_v58 = vpop.permute.xlu1 %980 }
 0x17e   : > { %v965_v60 = vpop.permute.xlu0 %964  ;;  %v1227_v37 = vsel %vm1212_vm7, %v1210_v19, %v981_v58 }
 0x17f   : > { %v1219_v52 = vsel %vm1212_vm7, %v1202_v21, %v965_v60 }
 0x181   : > { %v983_v11 = vpop.permute.xlu1 %982 }
 0x182   : > { %v967_v63 = vpop.permute.xlu0 %966  ;;  %v1228_v26 = vsel %vm1212_vm7, %v1211_v51, %v983_v11 }
 0x183   : > { %v1220_v47 = vsel %vm1212_vm7, %v1203_v12, %v967_v63 }
 0x185   : > { %v1045_v54 = vpop.permute.xlu1 %1044 }
 0x186   : > { %v1029_v0 = vpop.permute.xlu0 %1028  ;;  %v1244_v41 = vsel %vm1229_vm8, %v1227_v37, %v1045_v54 }
 0x187   : > { %v1236_v53 = vsel %vm1229_vm8, %v1219_v52, %v1029_v0 }
 0x189   : > { %v1047_v55 = vpop.permute.xlu1 %1046 }
 0x18a   : > { %v1031_v1 = vpop.permute.xlu0 %1030  ;;  %v1245_v40 = vsel %vm1229_vm8, %v1228_v26, %v1047_v55 }
 0x18b   : > { %v1237_v18 = vsel %vm1229_vm8, %v1220_v47, %v1031_v1 }
 0x18d   : > { %v1109_v42 = vpop.permute.xlu1 %1108 }
 0x18e   : > { %v1261_v50 = vsel %vm1246_vm9, %v1244_v41, %v1109_v42  ;;  %v1093_v25 = vpop.permute.xlu0 %1092 }
 0x18f   : > { %v1253_v46 = vsel %vm1246_vm9, %v1236_v53, %v1093_v25  ;;  %1877 = vmatprep.mubr.msk.f32.mxu1 %vm1275_vm10, %v1261_v50 }
 0x190   : > { %1865 = vmatprep.mubr.msk.f32.mxu0 %vm1275_vm10, %v1253_v46 }
 0x191   : > { %v1111_v29 = vpop.permute.xlu1 %1110 }
 0x192   : > { %v1262_v22 = vsel %vm1246_vm9, %v1245_v40, %v1111_v29  ;;  %v1095_v31 = vpop.permute.xlu0 %1094 }
 0x193   : > { %v1254_v43 = vsel %vm1246_vm9, %v1237_v18, %v1095_v31  ;;  %1878 = vmatmul.mubr.msk.f32.gmra.mrb[6].mxu1 %vm1275_vm10, %v1262_v22 }
 0x194   : > { %1866 = vmatmul.mubr.msk.f32.gmra.mrb[6].mxu0 %vm1275_vm10, %v1254_v43 }
 0x1ce   : > { %v1870_v13 = vpop.f32.mrb[0].mxu1 }
 0x1cf   : > { %v1858_v56 = vpop.f32.mrb[0].mxu0  ;;  %v1440_v62 = vadd.f32 %v1870_v13, %v2740_v24  ;;  %v1434_v2 = vpop.f32.mrb[1].mxu1 }
 0x1d0   : > { %v1400_v27 = vadd.f32 %v1858_v56, %v2740_v24  ;;  %v1394_v16 = vpop.f32.mrb[1].mxu0  ;;  %v1435_v20 = vadd.f32 %v2740_v24, %v1434_v2 }
 0x1d1   : > { %v1806_v45 = vmul.f32 -1.442695, %v1440_v62  ;;  %v1395_v3 = vadd.f32 %v2740_v24, %v1394_v16 }
 0x1d2   : > { %v1798_v10 = vmul.f32 -1.442695, %v1400_v27  ;;  %v1805_v32 = vmul.f32 -1.442695, %v1435_v20 }
 0x1d3   : > { %1955 = vpow2.f32 %v1806_v45  ;;  %v1797_v34 = vmul.f32 -1.442695, %v1395_v3 }
 0x1d4   : > { %1957 = vpow2.f32 %v1798_v10 }
 0x1d5   : > { %1959 = vpow2.f32 %v1797_v34 }
 0x1d6   : > { %1961 = vpow2.f32 %v1805_v32 }
 0x1dd   : > { %v1956_v61 = vpop.eup %1955 }
 0x1de   : > { %v1958_v33 = vpop.eup %1957  ;;  %v1530_v5 = vadd.f32 1.0, %v1956_v61 }
 0x1df   : > { %v1960_v7 = vpop.eup %1959  ;;  %v1522_v44 = vadd.f32 1.0, %v1958_v33 }
 0x1e0   : > { %v1962_v49 = vpop.eup %1961  ;;  %1963 = vrcp.f32 %v1530_v5  ;;  %v1521_v57 = vadd.f32 1.0, %v1960_v7 }
 0x1e1   : > { %1965 = vrcp.f32 %v1522_v44  ;;  %v1529_v48 = vadd.f32 1.0, %v1962_v49 }
 0x1e2   : > { %1967 = vrcp.f32 %v1521_v57 }
 0x1e3   : > { %1969 = vrcp.f32 %v1529_v48 }
 0x1ea   : > { %v1964_v36 = vpop.eup %1963 }
 0x1eb   : > { %v1966_v58 = vpop.eup %1965  ;;  %v1578_v60 = vmul.f32 %v1964_v36, %v1440_v62 }
 0x1ec   : > { %v1968_v11 = vpop.eup %1967  ;;  %v1570_v63 = vmul.f32 %v1966_v58, %v1400_v27 }
 0x1ed   : > { %v1970_v54 = vpop.eup %1969  ;;  %1594 = vst.msk [vmem:[%s2751_s28 + $0x48] sm:$0xff] %vm1144_vm3, %v1578_v60  ;;  %v1569_v0 = vmul.f32 %v1968_v11, %v1395_v3 }
 0x1ee   : > { %1586 = vst.msk [vmem:[%s2751_s28 + $0x8] sm:$0xff] %vm1144_vm3, %v1570_v63  ;;  %v1577_v15 = vmul.f32 %v1970_v54, %v1435_v20 }
 0x1ef   : > { %1585 = vst.msk [vmem:[%s2751_s28] sm:$0xff] %vm1144_vm3, %v1569_v0 }
 0x1f0   : > { %1593 = vst.msk [vmem:[%s2751_s28 + $0x40] sm:$0xff] %vm1144_vm3, %v1577_v15 }
 0x20e   : > { %v1861_v55 = vpop.f32.mrb[2].mxu0  ;;  %v1873_v38 = vpop.f32.mrb[2].mxu1 }
 0x20f   : > { %v1410_v39 = vadd.f32 %v1861_v55, %v2740_v24  ;;  %v1450_v1 = vadd.f32 %v1873_v38, %v2740_v24  ;;  %v1404_v17 = vpop.f32.mrb[3].mxu0  ;;  %v1444_v6 = vpop.f32.mrb[3].mxu1 }
 0x210   : > { %v1405_v14 = vadd.f32 %v2740_v24, %v1404_v17  ;;  %v1445_v19 = vadd.f32 %v2740_v24, %v1444_v6 }
 0x211   : > { %v1800_v35 = vmul.f32 -1.442695, %v1410_v39  ;;  %v1808_v28 = vmul.f32 -1.442695, %v1450_v1 }
 0x212   : > { %v1799_v59 = vmul.f32 -1.442695, %v1405_v14  ;;  %v1807_v21 = vmul.f32 -1.442695, %v1445_v19 }
 0x213   : > { %1971 = vpow2.f32 %v1800_v35 }
 0x214   : > { %1973 = vpow2.f32 %v1808_v28 }
 0x215   : > { %1975 = vpow2.f32 %v1799_v59 }
 0x216   : > { %1977 = vpow2.f32 %v1807_v21 }
 0x21d   : > { %v1972_v37 = vpop.eup %1971 }
 0x21e   : > { %v1974_v30 = vpop.eup %1973  ;;  %v1524_v23 = vadd.f32 1.0, %v1972_v37 }
 0x21f   : > { %v1976_v52 = vpop.eup %1975  ;;  %v1532_v41 = vadd.f32 1.0, %v1974_v30 }
 0x220   : > { %v1978_v42 = vpop.eup %1977  ;;  %1979 = vrcp.f32 %v1524_v23  ;;  %v1523_v8 = vadd.f32 1.0, %v1976_v52 }
 0x221   : > { %1981 = vrcp.f32 %v1532_v41  ;;  %v1531_v9 = vadd.f32 1.0, %v1978_v42 }
 0x222   : > { %1983 = vrcp.f32 %v1523_v8 }
 0x223   : > { %1985 = vrcp.f32 %v1531_v9 }
 0x22a   : > { %v1980_v53 = vpop.eup %1979 }
 0x22b   : > { %v1982_v50 = vpop.eup %1981  ;;  %v1572_v25 = vmul.f32 %v1980_v53, %v1410_v39 }
 0x22c   : > { %v1984_v4 = vpop.eup %1983  ;;  %v1580_v51 = vmul.f32 %v1982_v50, %v1450_v1 }
 0x22d   : > { %v1986_v46 = vpop.eup %1985  ;;  %1588 = vst.msk [vmem:[%s2751_s28 + $0x18] sm:$0xff] %vm1144_vm3, %v1572_v25  ;;  %v1571_v12 = vmul.f32 %v1984_v4, %v1405_v14 }
 0x22e   : > { %1596 = vst.msk [vmem:[%s2751_s28 + $0x58] sm:$0xff] %vm1144_vm3, %v1580_v51  ;;  %v1579_v26 = vmul.f32 %v1986_v46, %v1445_v19 }
 0x22f   : > { %1587 = vst.msk [vmem:[%s2751_s28 + $0x10] sm:$0xff] %vm1144_vm3, %v1571_v12 }
 0x230   : > { %1595 = vst.msk [vmem:[%s2751_s28 + $0x50] sm:$0xff] %vm1144_vm3, %v1579_v26 }
 0x24a   : > { %v1876_v47 = vpop.f32.mrb[4].mxu1 }
 0x24b   : > { %v1864_v40 = vpop.f32.mrb[4].mxu0  ;;  %v1460_v29 = vadd.f32 %v1876_v47, %v2740_v24  ;;  %v1454_v18 = vpop.f32.mrb[5].mxu1 }
 0x24c   : > { %v1420_v22 = vadd.f32 %v1864_v40, %v2740_v24  ;;  %v1414_v31 = vpop.f32.mrb[5].mxu0  ;;  %v1455_v43 = vadd.f32 %v2740_v24, %v1454_v18 }
 0x24d   : > { %v1810_v13 = vmul.f32 -1.442695, %v1460_v29  ;;  %v1415_v56 = vadd.f32 %v2740_v24, %v1414_v31 }
 0x24e   : > { %v1802_v62 = vmul.f32 -1.442695, %v1420_v22  ;;  %v1809_v2 = vmul.f32 -1.442695, %v1455_v43 }
 0x24f   : > { %1987 = vpow2.f32 %v1810_v13  ;;  %v1801_v27 = vmul.f32 -1.442695, %v1415_v56 }
 0x250   : > { %1989 = vpow2.f32 %v1802_v62 }
 0x251   : > { %1991 = vpow2.f32 %v1801_v27 }
 0x252   : > { %1993 = vpow2.f32 %v1809_v2 }
 0x259   : > { %v1988_v16 = vpop.eup %1987 }
 0x25a   : > { %v1990_v20 = vpop.eup %1989  ;;  %v1534_v45 = vadd.f32 1.0, %v1988_v16 }
 0x25b   : > { %v1992_v3 = vpop.eup %1991  ;;  %v1526_v10 = vadd.f32 1.0, %v1990_v20 }
 0x25c   : > { %v1994_v32 = vpop.eup %1993  ;;  %1995 = vrcp.f32 %v1534_v45  ;;  %v1525_v34 = vadd.f32 1.0, %v1992_v3 }
 0x25d   : > { %1997 = vrcp.f32 %v1526_v10  ;;  %v1533_v61 = vadd.f32 1.0, %v1994_v32 }
 0x25e   : > { %1999 = vrcp.f32 %v1525_v34 }
 0x25f   : > { %2001 = vrcp.f32 %v1533_v61 }
 0x266   : > { %v1996_v33 = vpop.eup %1995  ;;  %v1879_v5 = vpop.f32.mrb[6].mxu1 }
 0x267   : > { %v1998_v7 = vpop.eup %1997  ;;  %v1582_v44 = vmul.f32 %v1996_v33, %v1460_v29  ;;  %v1867_v49 = vpop.f32.mrb[6].mxu0  ;;  %v1470_v57 = vadd.f32 %v1879_v5, %v2740_v24 }
 0x268   : > { %v1464_v48 = vpop.f32.mrb[7].mxu1  ;;  %v2000_v36 = vpop.eup %1999  ;;  %v1574_v58 = vmul.f32 %v1998_v7, %v1420_v22  ;;  %v1430_v60 = vadd.f32 %v1867_v49, %v2740_v24 }
 0x269   : > { %v1424_v11 = vpop.f32.mrb[7].mxu0  ;;  %v1465_v63 = vadd.f32 %v2740_v24, %v1464_v48  ;;  %v2002_v54 = vpop.eup %2001  ;;  %1598 = vst.msk [vmem:[%s2751_s28 + $0x68] sm:$0xff] %vm1144_vm3, %v1582_v44  ;;  %v1573_v0 = vmul.f32 %v2000_v36, %v1415_v56  ;;  %v1812_v15 = vmul.f32 -1.442695, %v1470_v57 }
 0x26a   : > { %v1425_v55 = vadd.f32 %v2740_v24, %v1424_v11  ;;  %1590 = vst.msk [vmem:[%s2751_s28 + $0x28] sm:$0xff] %vm1144_vm3, %v1574_v58  ;;  %v1581_v38 = vmul.f32 %v2002_v54, %v1455_v43  ;;  %v1804_v39 = vmul.f32 -1.442695, %v1430_v60 }
 0x26b   : > { %v1811_v1 = vmul.f32 -1.442695, %v1465_v63  ;;  %1589 = vst.msk [vmem:[%s2751_s28 + $0x20] sm:$0xff] %vm1144_vm3, %v1573_v0  ;;  %2003 = vpow2.f32 %v1812_v15 }
 0x26c   : > { %v1803_v17 = vmul.f32 -1.442695, %v1425_v55  ;;  %1597 = vst.msk [vmem:[%s2751_s28 + $0x60] sm:$0xff] %vm1144_vm3, %v1581_v38  ;;  %2005 = vpow2.f32 %v1804_v39 }
 0x26e   : > { %2007 = vpow2.f32 %v1803_v17 }
 0x26f   : > { %2009 = vpow2.f32 %v1811_v1 }
 0x275   : > { %v2004_v6 = vpop.eup %2003 }
 0x276   : > { %v2006_v14 = vpop.eup %2005  ;;  %v1536_v19 = vadd.f32 1.0, %v2004_v6 }
 0x277   : > { %v1528_v24 = vadd.f32 1.0, %v2006_v14 }
 0x278   : > { %v2008_v35 = vpop.eup %2007  ;;  %2011 = vrcp.f32 %v1536_v19 }
 0x279   : > { %v2010_v28 = vpop.eup %2009  ;;  %v1527_v59 = vadd.f32 1.0, %v2008_v35  ;;  %2013 = vrcp.f32 %v1528_v24 }
 0x27a   : > { %v1535_v21 = vadd.f32 1.0, %v2010_v28 }
 0x27b   : > { %2015 = vrcp.f32 %v1527_v59 }
 0x27c   : > { %2017 = vrcp.f32 %v1535_v21 }
 0x282   : > { %v2012_v37 = vpop.eup %2011 }
 0x283   : > { %v2014_v30 = vpop.eup %2013  ;;  %v1584_v23 = vmul.f32 %v2012_v37, %v1470_v57 }
 0x284   : > { %v1576_v41 = vmul.f32 %v2014_v30, %v1430_v60 }
 0x285   : > { %v2016_v52 = vpop.eup %2015  ;;  %1600 = vst.msk [vmem:[%s2751_s28 + $0x78] sm:$0xff] %vm1144_vm3, %v1584_v23 }
 0x286   : > { %v2018_v42 = vpop.eup %2017  ;;  %v1575_v8 = vmul.f32 %v2016_v52, %v1425_v55  ;;  %1592 = vst.msk [vmem:[%s2751_s28 + $0x38] sm:$0xff] %vm1144_vm3, %v1576_v41 }
 0x287   : > { %v1583_v9 = vmul.f32 %v2018_v42, %v1465_v63 }
 0x288   : > { %1591 = vst.msk [vmem:[%s2751_s28 + $0x30] sm:$0xff] %vm1144_vm3, %v1575_v8 }
 0x289   : > { %1599 = vst.msk [vmem:[%s2751_s28 + $0x70] sm:$0xff] %vm1144_vm3, %v1583_v9 }
 0x28a PF: > { %s15_s22 = sadd.s32 1, %s2057_s22   ;;  %s2836_s18 = smov %s2049_s20 }
 0x28b   : > { %p12_p12 = scmp.ge.s32.totalorder %s15_s22, 6   ;;  %s2837_s19 = smov %s2053_s21 }
 0x28c   : > { %s2838_s20 = smov %s2841_s23  ;;  %s2839_s21 = smov %s2845_s24 }
 0x28d   :  { %14 = sbr.rel (!%p12_p12) target bundleno = 3 (0x3), region = 79 }

</bundles_post_ra>
